<compile_context>
chip_gen: v5e
topology: v5e:2x2
jax: 0.10.0
libtpu: 0.0.40
codegen_flags: <defaults>
</compile_context>

<pallas_src>
import functools

import jax
import jax.numpy as jnp
from jax.experimental import pallas as pl
from jax.experimental.pallas import tpu as pltpu


def _round_up(x, m):
    return ((x + m - 1) // m) * m


# ----------------------------- plain-JAX glue --------------------------------

def farthest_point_sample(xyz, npoint):
    """xyz: [B, N, C] -> centroid indices [B, npoint].
    NOTE: torch version starts from torch.randint(...); we start
    deterministically at index 0 (and avoid the buggy .view(B,1,6))."""
    B, N, C = xyz.shape

    def body(i, state):
        centroids, distance, farthest = state
        centroids = centroids.at[:, i].set(farthest)
        centroid = jnp.take_along_axis(xyz, farthest[:, None, None], axis=1)
        dist = jnp.sum((xyz - centroid) ** 2, axis=-1)
        distance = jnp.minimum(distance, dist)
        farthest = jnp.argmax(distance, axis=-1).astype(jnp.int32)
        return centroids, distance, farthest

    centroids = jnp.zeros((B, npoint), jnp.int32)
    distance = jnp.full((B, N), 1e10, jnp.float32)
    farthest = jnp.zeros((B,), jnp.int32)
    centroids, _, _ = jax.lax.fori_loop(0, npoint, body,
                                        (centroids, distance, farthest))
    return centroids


def index_points(points, idx):
    """points: [B, N, C]; idx: [B, S] or [B, S, K] -> [B, S(, K), C]."""
    B = points.shape[0]
    C = points.shape[-1]
    raw_shape = idx.shape
    idx_flat = idx.reshape(B, -1)
    idx_exp = jnp.broadcast_to(idx_flat[..., None], (B, idx_flat.shape[1], C))
    res = jnp.take_along_axis(points, idx_exp, axis=1)
    return res.reshape(*raw_shape, C)


def square_distance(src, dst):
    """src [B,N,C], dst [B,M,C] -> [B,N,M] squared distances."""
    return jnp.sum((src[:, :, None, :] - dst[:, None, :, :]) ** 2, axis=-1)


def query_ball_point(radius, nsample, xyz, new_xyz):
    """xyz [B,N,3], new_xyz [B,S,3] -> group_idx [B,S,nsample] (int32).
    Uses top_k over masked indices instead of a full sort over N."""
    B, N, _ = xyz.shape
    S = new_xyz.shape[1]
    sqrdists = square_distance(new_xyz, xyz)                         # [B,S,N]
    idx = jnp.broadcast_to(jnp.arange(N, dtype=jnp.int32), (B, S, N))
    masked = jnp.where(sqrdists > radius ** 2, jnp.int32(N), idx)
    # k smallest masked values == first k in-radius indices, padded with N
    neg_topk, _ = jax.lax.top_k(-masked, nsample)
    group_idx = -neg_topk                                            # ascending
    group_first = jnp.broadcast_to(group_idx[:, :, :1], (B, S, nsample))
    group_idx = jnp.where(group_idx == N, group_first, group_idx)
    return group_idx


# ----------------------------- Pallas kernel ----------------------------------

def _make_mlp_max_kernel(num_layers, rows_tile, K):
    """One grid step: [rows_tile*K, Cin_pad] bf16 rows -> shared MLP
    (bf16 matmul, f32 accumulate, bias+ReLU in f32) -> max over the K
    neighbors -> [rows_tile, H_last_pad] f32."""

    def kernel(x_ref, *refs):
        out_ref = refs[-1]
        p = refs[:-1]              # per layer: w [Cprev_pad, H_pad] bf16, b [1, H_pad] f32
        x = x_ref[...]             # bf16
        for j in range(num_layers):
            w = p[2 * j][...]
            b = p[2 * j + 1][...]
            y = jnp.dot(x, w, preferred_element_type=jnp.float32)   # MXU, bf16 in / f32 acc
            y = jnp.maximum(y + b, 0.0)                             # folded-BN bias + ReLU (f32)
            x = y.astype(jnp.bfloat16) if j + 1 < num_layers else y
        H = x.shape[-1]
        out_ref[...] = jnp.max(x.reshape(rows_tile, K, H), axis=1)  # max over neighbors

    return kernel


def msg_mlp_max_pallas(grouped, layer_params, *, vmem_budget_bytes=20 << 20):
    """grouped: [B, S, K, Cin] float32, K a multiple of 8.
    layer_params: list of dicts with BN-folded 'w' [Cin_j, H_j] and 'bias' [H_j].
    Returns [B, S, H_last] float32."""
    B, S, K, Cin = grouped.shape
    num_layers = len(layer_params)

    cin_pad = _round_up(Cin, 8)
    h_pads = [_round_up(lp["w"].shape[1], 128) for lp in layer_params]
    h_last = layer_params[-1]["w"].shape[1]
    h_last_pad = h_pads[-1]
    h_max_pad = max(h_pads)

    # Row-tile sized against a conservative VMEM budget (fits v7x's 64 MiB/TC):
    # bf16 input slab (double-buffered) + ~2 live f32 activation slabs.
    rows = B * S
    bytes_per_row = K * (cin_pad * 2 * 2 + h_max_pad * 4 * 2)
    ts = max(8, min(rows, vmem_budget_bytes // max(bytes_per_row, 1)))
    ts = max(8, (ts // 8) * 8)
    rows_pad = _round_up(rows, ts)
    grid = rows_pad // ts

    # Flatten + pad in the wrapper (lane/sublane-aligned DMA, no in-kernel relayout).
    x = grouped.reshape(rows, K, Cin)
    x = jnp.pad(x, ((0, rows_pad - rows), (0, 0), (0, cin_pad - Cin)))
    x = x.reshape(rows_pad * K, cin_pad).astype(jnp.bfloat16)

    in_specs = [pl.BlockSpec((ts * K, cin_pad), lambda i: (i, 0))]
    args = [x]
    cprev, cprev_pad = Cin, cin_pad
    for lp, hp in zip(layer_params, h_pads):
        w = lp["w"].astype(jnp.float32)
        b = lp["bias"].astype(jnp.float32)
        h = w.shape[1]
        # Zero-pad weights/bias so padded channels stay exactly 0 through ReLU.
        wp = jnp.zeros((cprev_pad, hp), jnp.float32).at[:cprev, :h].set(w)
        bp = jnp.zeros((1, hp), jnp.float32).at[:, :h].set(b)
        wp = wp.astype(jnp.bfloat16)
        in_specs.append(pl.BlockSpec(wp.shape, lambda i: (0, 0)))
        args.append(wp)
        in_specs.append(pl.BlockSpec(bp.shape, lambda i: (0, 0)))
        args.append(bp)
        cprev, cprev_pad = h, hp

    out_spec = pl.BlockSpec((ts, h_last_pad), lambda i: (i, 0))

    out = pl.pallas_call(
        _make_mlp_max_kernel(num_layers, ts, K),
        out_shape=jax.ShapeDtypeStruct((rows_pad, h_last_pad), jnp.float32),
        grid=(grid,),
        in_specs=in_specs,
        out_specs=out_spec,
        compiler_params=pltpu.CompilerParams(
            dimension_semantics=("parallel",),
            vmem_limit_bytes=32 << 20),
    )(*args)

    return out[:rows, :h_last].reshape(B, S, h_last)


# ----------------------------- module forward ---------------------------------

def pointnet_sa_msg_forward(xyz, points, folded_params, *, npoint, radius_list,
                            nsample_list, knn=False, seed_idx=None):
    """xyz: [B, N, 3], points: [B, N, D] or None.
    Returns new_xyz [B, S, 3], new_points_concat [B, S, sum(mlp[-1])]
    (matching the torch module's final .transpose(1, 2))."""
    B, N, C = xyz.shape
    S = npoint
    if seed_idx is None:
        seed_idx = farthest_point_sample(xyz, S)
    new_xyz = index_points(xyz, seed_idx)                           # [B, S, 3]

    new_points_list = []
    for i, radius in enumerate(radius_list):
        K = nsample_list[i]
        if knn:
            dists = square_distance(new_xyz, xyz)
            group_idx = jnp.argsort(dists, axis=-1)[:, :, :K].astype(jnp.int32)
        else:
            group_idx = query_ball_point(radius, K, xyz, new_xyz)
        # Pad K to a multiple of 8 by repeating the first neighbor; max-pool
        # over duplicated neighbors is unchanged, but the in-kernel (8,128)
        # tiling stays aligned.
        K_pad = _round_up(K, 8)
        if K_pad != K:
            pad_idx = jnp.broadcast_to(group_idx[:, :, :1], (B, S, K_pad - K))
            group_idx = jnp.concatenate([group_idx, pad_idx], axis=-1)

        grouped_xyz = index_points(xyz, group_idx)                  # [B,S,Kp,3]
        grouped_xyz = grouped_xyz - new_xyz[:, :, None, :]
        if points is not None:
            grouped_points = index_points(points, group_idx)        # [B,S,Kp,D]
            grouped_points = jnp.concatenate([grouped_points, grouped_xyz], axis=-1)
        else:
            grouped_points = grouped_xyz

        new_points = msg_mlp_max_pallas(grouped_points.astype(jnp.float32),
                                        folded_params[i])
        new_points_list.append(new_points)

    new_points_concat = jnp.concatenate(new_points_list, axis=-1)   # [B, S, D']
    return new_xyz, new_points_concat


# ----------------------------- params ------------------------------------------

def init_params(key, in_channel, mlp_list, bn_eps=1e-5):
    """Deterministic synthetic conv + BatchNorm(eval) parameters."""
    params = []
    for mlp in mlp_list:
        layers = []
        last = in_channel + 3
        for out_ch in mlp:
            key, k1, k2, k3, k4, k5, k6 = jax.random.split(key, 7)
            layers.append({
                "w": jax.random.normal(k1, (last, out_ch), jnp.float32) * 0.1,
                "b": jax.random.normal(k2, (out_ch,), jnp.float32) * 0.01,
                "gamma": 1.0 + 0.1 * jax.random.normal(k3, (out_ch,), jnp.float32),
                "beta": 0.01 * jax.random.normal(k4, (out_ch,), jnp.float32),
                "mean": 0.01 * jax.random.normal(k5, (out_ch,), jnp.float32),
                "var": 1.0 + 0.1 * jax.random.uniform(k6, (out_ch,), jnp.float32),
                "eps": bn_eps,
            })
            last = out_ch
        params.append(layers)
    return params


def fold_bn_params(params):
    """Fold eval-mode BatchNorm into the 1x1 conv: y = x @ w' + bias',
    with w' = w * scale and bias' = b * scale + shift (exact algebra)."""
    folded = []
    for layers in params:
        fl = []
        for lp in layers:
            scale = lp["gamma"] / jnp.sqrt(lp["var"] + lp["eps"])
            shift = lp["beta"] - lp["mean"] * scale
            fl.append({"w": lp["w"] * scale[None, :],
                       "bias": lp["b"] * scale + shift})
        folded.append(fl)
    return folded


# ----------------------------- main --------------------------------------------

if __name__ == "__main__":
    key = jax.random.PRNGKey(0)
    B, N, D = 2, 32, 4          # batch, points, extra feature channels
    npoint = 16
    radius_list = [0.4, 0.8]
    nsample_list = [8, 16]
    mlp_list = [[16, 32], [16, 32, 48]]

    kx, kp, kw = jax.random.split(key, 3)
    xyz = jax.random.uniform(kx, (B, N, 3), jnp.float32)
    points = jax.random.normal(kp, (B, N, D), jnp.float32)

    params = init_params(kw, D, mlp_list)
    folded = fold_bn_params(params)

    fwd = jax.jit(functools.partial(
        pointnet_sa_msg_forward,
        npoint=npoint, radius_list=radius_list,
        nsample_list=nsample_list, knn=False))

    new_xyz, new_points = fwd(xyz, points, folded)
    jax.block_until_ready((new_xyz, new_points))

    assert new_xyz.shape == (B, npoint, 3)
    assert new_points.shape == (B, npoint, sum(m[-1] for m in mlp_list))
    print("KERNEL_OK")
</pallas_src>

<mosaic_0001>
module attributes {stable_mosaic.version = 11 : i64} {
  func.func @kernel(%arg0: i32, %arg1: memref<512x8xbf16, #tpu.memory_space<vmem>>, %arg2: memref<8x128xbf16, #tpu.memory_space<vmem>>, %arg3: memref<1x128xf32, #tpu.memory_space<vmem>>, %arg4: memref<128x128xbf16, #tpu.memory_space<vmem>>, %arg5: memref<1x128xf32, #tpu.memory_space<vmem>>, %arg6: memref<128x128xbf16, #tpu.memory_space<vmem>>, %arg7: memref<1x128xf32, #tpu.memory_space<vmem>>, %arg8: memref<32x128xf32, #tpu.memory_space<vmem>>) attributes {dimension_semantics = [#tpu.dimension_semantics<parallel>], iteration_bounds = array<i64: 1>, scalar_prefetch = 0 : i64, scratch_operands = 0 : i64, tpu.core_type = #tpu.core_type<tc>, window_params = [{transform_indices = @transform_0, window_bounds = array<i64: 512, 8>}, {pipeline_mode = #tpu.pipeline_mode<synchronous>, transform_indices = @transform_1, window_bounds = array<i64: 8, 128>}, {pipeline_mode = #tpu.pipeline_mode<synchronous>, transform_indices = @transform_2, window_bounds = array<i64: 1, 128>}, {pipeline_mode = #tpu.pipeline_mode<synchronous>, transform_indices = @transform_3, window_bounds = array<i64: 128, 128>}, {pipeline_mode = #tpu.pipeline_mode<synchronous>, transform_indices = @transform_4, window_bounds = array<i64: 1, 128>}, {pipeline_mode = #tpu.pipeline_mode<synchronous>, transform_indices = @transform_5, window_bounds = array<i64: 128, 128>}, {pipeline_mode = #tpu.pipeline_mode<synchronous>, transform_indices = @transform_6, window_bounds = array<i64: 1, 128>}, {transform_indices = @transform_7, window_bounds = array<i64: 32, 128>}]} {
    %c0 = arith.constant 0 : index
    %c0_0 = arith.constant 0 : index
    %0 = vector.load %arg1[%c0, %c0_0] : memref<512x8xbf16, #tpu.memory_space<vmem>>, vector<512x8xbf16>
    %c0_1 = arith.constant 0 : index
    %c0_2 = arith.constant 0 : index
    %1 = vector.load %arg2[%c0_1, %c0_2] : memref<8x128xbf16, #tpu.memory_space<vmem>>, vector<8x128xbf16>
    %c0_3 = arith.constant 0 : index
    %c0_4 = arith.constant 0 : index
    %2 = vector.load %arg3[%c0_3, %c0_4] : memref<1x128xf32, #tpu.memory_space<vmem>>, vector<1x128xf32>
    %cst = arith.constant dense<0.000000e+00> : vector<512x128xf32>
    %3 = tpu.matmul %0, %1, %cst {dimension_numbers = #tpu.dot_dimension_numbers<[1], [0], [0], [1], [0, 0, 1, 1], [], []>} : vector<512x8xbf16>, vector<8x128xbf16>, vector<512x128xf32> -> vector<512x128xf32>
    %4 = vector.broadcast %2 : vector<1x128xf32> to vector<512x128xf32>
    %5 = arith.addf %3, %4 : vector<512x128xf32>
    %cst_5 = arith.constant 0.000000e+00 : f32
    %6 = vector.broadcast %cst_5 : f32 to vector<512x128xf32>
    %7 = arith.maximumf %5, %6 : vector<512x128xf32>
    %8 = arith.truncf %7 : vector<512x128xf32> to vector<512x128xbf16>
    %c0_6 = arith.constant 0 : index
    %c0_7 = arith.constant 0 : index
    %9 = vector.load %arg4[%c0_6, %c0_7] : memref<128x128xbf16, #tpu.memory_space<vmem>>, vector<128x128xbf16>
    %c0_8 = arith.constant 0 : index
    %c0_9 = arith.constant 0 : index
    %10 = vector.load %arg5[%c0_8, %c0_9] : memref<1x128xf32, #tpu.memory_space<vmem>>, vector<1x128xf32>
    %cst_10 = arith.constant dense<0.000000e+00> : vector<512x128xf32>
    %11 = tpu.matmul %8, %9, %cst_10 {dimension_numbers = #tpu.dot_dimension_numbers<[1], [0], [0], [1], [0, 0, 1, 1], [], []>} : vector<512x128xbf16>, vector<128x128xbf16>, vector<512x128xf32> -> vector<512x128xf32>
    %12 = vector.broadcast %10 : vector<1x128xf32> to vector<512x128xf32>
    %13 = arith.addf %11, %12 : vector<512x128xf32>
    %cst_11 = arith.constant 0.000000e+00 : f32
    %14 = vector.broadcast %cst_11 : f32 to vector<512x128xf32>
    %15 = arith.maximumf %13, %14 : vector<512x128xf32>
    %16 = arith.truncf %15 : vector<512x128xf32> to vector<512x128xbf16>
    %c0_12 = arith.constant 0 : index
    %c0_13 = arith.constant 0 : index
    %17 = vector.load %arg6[%c0_12, %c0_13] : memref<128x128xbf16, #tpu.memory_space<vmem>>, vector<128x128xbf16>
    %c0_14 = arith.constant 0 : index
    %c0_15 = arith.constant 0 : index
    %18 = vector.load %arg7[%c0_14, %c0_15] : memref<1x128xf32, #tpu.memory_space<vmem>>, vector<1x128xf32>
    %cst_16 = arith.constant dense<0.000000e+00> : vector<512x128xf32>
    %19 = tpu.matmul %16, %17, %cst_16 {dimension_numbers = #tpu.dot_dimension_numbers<[1], [0], [0], [1], [0, 0, 1, 1], [], []>} : vector<512x128xbf16>, vector<128x128xbf16>, vector<512x128xf32> -> vector<512x128xf32>
    %20 = vector.broadcast %18 : vector<1x128xf32> to vector<512x128xf32>
    %21 = arith.addf %19, %20 : vector<512x128xf32>
    %cst_17 = arith.constant 0.000000e+00 : f32
    %22 = vector.broadcast %cst_17 : f32 to vector<512x128xf32>
    %23 = arith.maximumf %21, %22 : vector<512x128xf32>
    %24 = vector.shape_cast %23 : vector<512x128xf32> to vector<32x16x128xf32>
    %cst_18 = arith.constant dense<0xFF800000> : vector<32x128xf32>
    %25 = vector.multi_reduction <maximumf>, %24, %cst_18 [1] : vector<32x16x128xf32> to vector<32x128xf32>
    %c0_19 = arith.constant 0 : index
    %c0_20 = arith.constant 0 : index
    %26 = vector.load %arg8[%c0_19, %c0_20] : memref<32x128xf32, #tpu.memory_space<vmem>>, vector<32x128xf32>
    tpu.vector_store %arg8[%c0_19, %c0_20], %25 {strides = array<i32>} : memref<32x128xf32, #tpu.memory_space<vmem>>, vector<32x128xf32>,
    return
  }
  func.func @transform_0(%arg0: i32) -> (i32, i32) {
    %c0_i32 = arith.constant 0 : i32
    %c0_i32_0 = arith.constant 0 : i32
    return %arg0, %c0_i32 : i32, i32
  }
  func.func @transform_1(%arg0: i32) -> (i32, i32) {
    %c0_i32 = arith.constant 0 : i32
    %c0_i32_0 = arith.constant 0 : i32
    %c0_i32_1 = arith.constant 0 : i32
    return %c0_i32, %c0_i32_0 : i32, i32
  }
  func.func @transform_2(%arg0: i32) -> (i32, i32) {
    %c0_i32 = arith.constant 0 : i32
    %c0_i32_0 = arith.constant 0 : i32
    %c0_i32_1 = arith.constant 0 : i32
    return %c0_i32, %c0_i32_0 : i32, i32
  }
  func.func @transform_3(%arg0: i32) -> (i32, i32) {
    %c0_i32 = arith.constant 0 : i32
    %c0_i32_0 = arith.constant 0 : i32
    %c0_i32_1 = arith.constant 0 : i32
    return %c0_i32, %c0_i32_0 : i32, i32
  }
  func.func @transform_4(%arg0: i32) -> (i32, i32) {
    %c0_i32 = arith.constant 0 : i32
    %c0_i32_0 = arith.constant 0 : i32
    %c0_i32_1 = arith.constant 0 : i32
    return %c0_i32, %c0_i32_0 : i32, i32
  }
  func.func @transform_5(%arg0: i32) -> (i32, i32) {
    %c0_i32 = arith.constant 0 : i32
    %c0_i32_0 = arith.constant 0 : i32
    %c0_i32_1 = arith.constant 0 : i32
    return %c0_i32, %c0_i32_0 : i32, i32
  }
  func.func @transform_6(%arg0: i32) -> (i32, i32) {
    %c0_i32 = arith.constant 0 : i32
    %c0_i32_0 = arith.constant 0 : i32
    %c0_i32_1 = arith.constant 0 : i32
    return %c0_i32, %c0_i32_0 : i32, i32
  }
  func.func @transform_7(%arg0: i32) -> (i32, i32) {
    %c0_i32 = arith.constant 0 : i32
    %c0_i32_0 = arith.constant 0 : i32
    return %arg0, %c0_i32 : i32, i32
  }
}

module attributes {stable_mosaic.version = 11 : i64} {
  func.func @kernel(%arg0: i32, %arg1: memref<256x8xbf16, #tpu.memory_space<vmem>>, %arg2: memref<8x128xbf16, #tpu.memory_space<vmem>>, %arg3: memref<1x128xf32, #tpu.memory_space<vmem>>, %arg4: memref<128x128xbf16, #tpu.memory_space<vmem>>, %arg5: memref<1x128xf32, #tpu.memory_space<vmem>>, %arg6: memref<32x128xf32, #tpu.memory_space<vmem>>) attributes {dimension_semantics = [#tpu.dimension_semantics<parallel>], iteration_bounds = array<i64: 1>, scalar_prefetch = 0 : i64, scratch_operands = 0 : i64, tpu.core_type = #tpu.core_type<tc>, window_params = [{transform_indices = @transform_0, window_bounds = array<i64: 256, 8>}, {pipeline_mode = #tpu.pipeline_mode<synchronous>, transform_indices = @transform_1, window_bounds = array<i64: 8, 128>}, {pipeline_mode = #tpu.pipeline_mode<synchronous>, transform_indices = @transform_2, window_bounds = array<i64: 1, 128>}, {pipeline_mode = #tpu.pipeline_mode<synchronous>, transform_indices = @transform_3, window_bounds = array<i64: 128, 128>}, {pipeline_mode = #tpu.pipeline_mode<synchronous>, transform_indices = @transform_4, window_bounds = array<i64: 1, 128>}, {transform_indices = @transform_5, window_bounds = array<i64: 32, 128>}]} {
    %c0 = arith.constant 0 : index
    %c0_0 = arith.constant 0 : index
    %0 = vector.load %arg1[%c0, %c0_0] : memref<256x8xbf16, #tpu.memory_space<vmem>>, vector<256x8xbf16>
    %c0_1 = arith.constant 0 : index
    %c0_2 = arith.constant 0 : index
    %1 = vector.load %arg2[%c0_1, %c0_2] : memref<8x128xbf16, #tpu.memory_space<vmem>>, vector<8x128xbf16>
    %c0_3 = arith.constant 0 : index
    %c0_4 = arith.constant 0 : index
    %2 = vector.load %arg3[%c0_3, %c0_4] : memref<1x128xf32, #tpu.memory_space<vmem>>, vector<1x128xf32>
    %cst = arith.constant dense<0.000000e+00> : vector<256x128xf32>
    %3 = tpu.matmul %0, %1, %cst {dimension_numbers = #tpu.dot_dimension_numbers<[1], [0], [0], [1], [0, 0, 1, 1], [], []>} : vector<256x8xbf16>, vector<8x128xbf16>, vector<256x128xf32> -> vector<256x128xf32>
    %4 = vector.broadcast %2 : vector<1x128xf32> to vector<256x128xf32>
    %5 = arith.addf %3, %4 : vector<256x128xf32>
    %cst_5 = arith.constant 0.000000e+00 : f32
    %6 = vector.broadcast %cst_5 : f32 to vector<256x128xf32>
    %7 = arith.maximumf %5, %6 : vector<256x128xf32>
    %8 = arith.truncf %7 : vector<256x128xf32> to vector<256x128xbf16>
    %c0_6 = arith.constant 0 : index
    %c0_7 = arith.constant 0 : index
    %9 = vector.load %arg4[%c0_6, %c0_7] : memref<128x128xbf16, #tpu.memory_space<vmem>>, vector<128x128xbf16>
    %c0_8 = arith.constant 0 : index
    %c0_9 = arith.constant 0 : index
    %10 = vector.load %arg5[%c0_8, %c0_9] : memref<1x128xf32, #tpu.memory_space<vmem>>, vector<1x128xf32>
    %cst_10 = arith.constant dense<0.000000e+00> : vector<256x128xf32>
    %11 = tpu.matmul %8, %9, %cst_10 {dimension_numbers = #tpu.dot_dimension_numbers<[1], [0], [0], [1], [0, 0, 1, 1], [], []>} : vector<256x128xbf16>, vector<128x128xbf16>, vector<256x128xf32> -> vector<256x128xf32>
    %12 = vector.broadcast %10 : vector<1x128xf32> to vector<256x128xf32>
    %13 = arith.addf %11, %12 : vector<256x128xf32>
    %cst_11 = arith.constant 0.000000e+00 : f32
    %14 = vector.broadcast %cst_11 : f32 to vector<256x128xf32>
    %15 = arith.maximumf %13, %14 : vector<256x128xf32>
    %16 = vector.shape_cast %15 : vector<256x128xf32> to vector<32x8x128xf32>
    %cst_12 = arith.constant dense<0xFF800000> : vector<32x128xf32>
    %17 = vector.multi_reduction <maximumf>, %16, %cst_12 [1] : vector<32x8x128xf32> to vector<32x128xf32>
    %c0_13 = arith.constant 0 : index
    %c0_14 = arith.constant 0 : index
    %18 = vector.load %arg6[%c0_13, %c0_14] : memref<32x128xf32, #tpu.memory_space<vmem>>, vector<32x128xf32>
    tpu.vector_store %arg6[%c0_13, %c0_14], %17 {strides = array<i32>} : memref<32x128xf32, #tpu.memory_space<vmem>>, vector<32x128xf32>,
    return
  }
  func.func @transform_0(%arg0: i32) -> (i32, i32) {
    %c0_i32 = arith.constant 0 : i32
    %c0_i32_0 = arith.constant 0 : i32
    return %arg0, %c0_i32 : i32, i32
  }
  func.func @transform_1(%arg0: i32) -> (i32, i32) {
    %c0_i32 = arith.constant 0 : i32
    %c0_i32_0 = arith.constant 0 : i32
    %c0_i32_1 = arith.constant 0 : i32
    return %c0_i32, %c0_i32_0 : i32, i32
  }
  func.func @transform_2(%arg0: i32) -> (i32, i32) {
    %c0_i32 = arith.constant 0 : i32
    %c0_i32_0 = arith.constant 0 : i32
    %c0_i32_1 = arith.constant 0 : i32
    return %c0_i32, %c0_i32_0 : i32, i32
  }
  func.func @transform_3(%arg0: i32) -> (i32, i32) {
    %c0_i32 = arith.constant 0 : i32
    %c0_i32_0 = arith.constant 0 : i32
    %c0_i32_1 = arith.constant 0 : i32
    return %c0_i32, %c0_i32_0 : i32, i32
  }
  func.func @transform_4(%arg0: i32) -> (i32, i32) {
    %c0_i32 = arith.constant 0 : i32
    %c0_i32_0 = arith.constant 0 : i32
    %c0_i32_1 = arith.constant 0 : i32
    return %c0_i32, %c0_i32_0 : i32, i32
  }
  func.func @transform_5(%arg0: i32) -> (i32, i32) {
    %c0_i32 = arith.constant 0 : i32
    %c0_i32_0 = arith.constant 0 : i32
    return %arg0, %c0_i32 : i32, i32
  }
}

</mosaic_0001>

<bundles_post_ra>
// kernel: custom-call.12
= control target key start
LH: loop header
LB: loop body
LE: loop exit
PB: predicated region body
PF: predicated region fallthrough
CT: control target
= control target key end

     0   :  { %s6_s0 = inlined_call_operand.vmem [shape: f32[2,32], index: 0, kind: output, shape index: {}]  }

// kernel: pointnet_sa_msg_forward.3
= control target key start
LH: loop header
LB: loop body
LE: loop exit
PB: predicated region body
PF: predicated region fallthrough
CT: control target
= control target key end

     0   :  { %vm353_vm0 = vcmask 1043456   ;;  %vm256_vm1 = vcmask 64512   ;;  %vm1512_vm2 = vcmask 1041409   ;;  %vm1514_vm3 = vcmask 1042434   ;;  %s2379_s1 = inlined_call_operand.vmem [shape: bf16[8,128], index: 1, kind: input, shape index: {}]   ;;  %s2380_s0 = inlined_call_operand.vmem [shape: bf16[512,8], index: 0, kind: input, shape index: {}]   ;;  %s2381_s2 = inlined_call_operand.vmem [shape: f32[1,128], index: 2, kind: input, shape index: {}]   ;;  %s2382_s3 = inlined_call_operand.vmem [shape: bf16[128,128], index: 3, kind: input, shape index: {}]   ;;  %s2383_s4 = inlined_call_operand.vmem [shape: f32[1,128], index: 4, kind: input, shape index: {}]   ;;  %s2384_s5 = inlined_call_operand.vmem [shape: bf16[128,128], index: 5, kind: input, shape index: {}]   ;;  %s2385_s6 = inlined_call_operand.vmem [shape: f32[1,128], index: 6, kind: input, shape index: {}]   ;;  %s2386_s7 = inlined_call_operand.vmem [shape: f32[32,128], index: 7, kind: output, shape index: {}]  }
   0x1   :  { %v91_v0 = vld [vmem:[%s2379_s1] sm:$0xf]  ;;  %v1784_v3 = vld [vmem:[%s2380_s0 + $0x8] sm:$0xff]  ;;  %v1785_v4 = vld [vmem:[%s2380_s0 + $0x10] sm:$0xff]  ;;  %vm1516_vm4 = vcmask 1043459   ;;  %vm1518_vm5 = vcmask 1044484  }
   0x2   :  { %v355_v1 = vsel %vm353_vm0, %v91_v0, 0  ;;  %v1783_v2 = vld [vmem:[%s2380_s0] sm:$0xff]  ;;  %v1786_v5 = vld [vmem:[%s2380_s0 + $0x18] sm:$0xff]  ;;  %v1788_v8 = vld [vmem:[%s2380_s0 + $0x28] sm:$0xff]  ;;  %vm1520_vm6 = vcmask 1045509   ;;  %vm1522_vm7 = vcmask 1046534  }
   0x3   :  { %364 = vmatpush.bf16.msra.mxu0 %v355_v1  ;;  %1831 = vmatpush.bf16.msra.mxu3 %v355_v1  ;;  %v1787_v6 = vld [vmem:[%s2380_s0 + $0x20] sm:$0xff]  ;;  %v1822_v7 = vld [vmem:[%s2382_s3 + $0x38] sm:$0xff]  ;;  %v1821_v9 = vld [vmem:[%s2382_s3 + $0x30] sm:$0xff]  ;;  %vm1524_vm8 = vcmask 1047559  }
   0x4   :  { %690 = vmatpush.bf16.msra.mxu1 %v1822_v7  ;;  %v1820_v10 = vld [vmem:[%s2382_s3 + $0x28] sm:$0xff]  ;;  %v1819_v11 = vld [vmem:[%s2382_s3 + $0x20] sm:$0xff]  ;;  %v1818_v12 = vld [vmem:[%s2382_s3 + $0x18] sm:$0xff] }
   0x5   :  { %v1789_v13 = vld [vmem:[%s2380_s0 + $0x30] sm:$0xff]  ;;  %v1816_v15 = vld [vmem:[%s2382_s3 + $0x8] sm:$0xff]  ;;  %v1815_v16 = vld [vmem:[%s2382_s3] sm:$0xff] }
   0x6   :  { %1687 = vmatmul.msk.bf16.vlgmr.msra.gmra.mxu0 %vm256_vm1, %v1783_v2  ;;  %v1817_v14 = vld [vmem:[%s2382_s3 + $0x10] sm:$0xff]  ;;  %v1790_v17 = vld [vmem:[%s2380_s0 + $0x38] sm:$0xff]  ;;  %v1791_v18 = vld [vmem:[%s2380_s0 + $0x40] sm:$0xff] }
   0x7   :  { %1832 = vmatpush.bf16.msrb.mxu3 %v1822_v7  ;;  %v1959_v20 = vld [vmem:[%s2381_s2] ss:$0 sm:$0xff]  ;;  %v1792_v27 = vld [vmem:[%s2380_s0 + $0x48] sm:$0xff]  ;;  %v1793_v35 = vld [vmem:[%s2380_s0 + $0x50] sm:$0xff] }
   0x8   :  { %691 = vmatpush.bf16.msra.mxu1 %v1821_v9  ;;  %v1794_v43 = vld [vmem:[%s2380_s0 + $0x58] sm:$0xff]  ;;  %v1795_v51 = vld [vmem:[%s2380_s0 + $0x60] sm:$0xff]  ;;  %v1796_v59 = vld [vmem:[%s2380_s0 + $0x68] sm:$0xff] }
   0x9   :  { %v1997_v0 = vld [vmem:[%s2384_s5 + $0x38] sm:$0xff]  ;;  %v2012_v7 = vld [vmem:[%s2384_s5 + $0x28] sm:$0xff] }
   0xa   :  { %1023 = vmatpush.bf16.msra.mxu2 %v1997_v0 }
   0xb   :  { %1833 = vmatpush.bf16.msrb.mxu3 %v1821_v9 }
   0xc   :  { %692 = vmatpush.bf16.msra.mxu1 %v1820_v10 }
   0xf   :  { %1834 = vmatpush.bf16.msrb.mxu3 %v1820_v10 }
  0x10   :  { %693 = vmatpush.bf16.msra.mxu1 %v1819_v11 }
  0x13   :  { %1835 = vmatpush.bf16.msrb.mxu3 %v1819_v11 }
  0x14   :  { %694 = vmatpush.bf16.msra.mxu1 %v1818_v12 }
  0x16   :  { %1688 = vmatmul.msk.bf16.gmra.mxu0 %vm256_vm1, %v1784_v3 }
  0x17   :  { %1836 = vmatpush.bf16.msrb.mxu3 %v1818_v12  ;;  %v2027_v12 = vld [vmem:[%s2384_s5 + $0x18] sm:$0xff] }
  0x18   :  { %695 = vmatpush.bf16.msra.mxu1 %v1817_v14 }
  0x1b   :  { %1837 = vmatpush.bf16.msrb.mxu3 %v1817_v14 }
  0x1c   :  { %696 = vmatpush.bf16.msra.mxu1 %v1816_v15 }
  0x1f   :  { %1838 = vmatpush.bf16.msrb.mxu3 %v1816_v15 }
  0x20   :  { %697 = vmatpush.bf16.msra.mxu1 %v1815_v16 }
  0x23   :  { %1839 = vmatpush.bf16.msrb.mxu3 %v1815_v16  ;;  %v2033_v16 = vld [vmem:[%s2384_s5 + $0x10] sm:$0xff] }
  0x26   :  { %1689 = vmatmul.msk.bf16.gmra.mxu0 %vm256_vm1, %v1785_v4  ;;  %v2003_v4 = vld [vmem:[%s2384_s5 + $0x30] sm:$0xff] }
  0x27   :  { %1024 = vmatpush.bf16.msra.mxu2 %v2003_v4 }
  0x2b   :  { %1025 = vmatpush.bf16.msra.mxu2 %v2012_v7 }
  0x36   :  { %1690 = vmatmul.msk.bf16.gmra.mxu0 %vm256_vm1, %v1786_v5  ;;  %v1797_v5 = vld [vmem:[%s2380_s0 + $0x70] sm:$0xff] }
  0x46   :  { %1691 = vmatmul.msk.bf16.gmra.mxu0 %vm256_vm1, %v1787_v6 }
  0x56   :  { %1692 = vmatmul.msk.bf16.gmra.mxu0 %vm256_vm1, %v1788_v8  ;;  %v2019_v8 = vld [vmem:[%s2384_s5 + $0x20] sm:$0xff] }
  0x57   :  { %1026 = vmatpush.bf16.msra.mxu2 %v2019_v8 }
  0x5b   :  { %1027 = vmatpush.bf16.msra.mxu2 %v2027_v12 }
  0x5f   :  { %1028 = vmatpush.bf16.msra.mxu2 %v2033_v16 }
  0x66   :  { %1693 = vmatmul.msk.bf16.gmra.mxu0 %vm256_vm1, %v1789_v13 }
  0x76   :  { %1694 = vmatmul.msk.bf16.gmra.mxu0 %vm256_vm1, %v1790_v17  ;;  %v1798_v17 = vld [vmem:[%s2380_s0 + $0x78] sm:$0xff] }
  0x83   :  { %v366_v19 = vpop.f32.mrf.mxu0 }
  0x84   :  { %v367_v21 = vadd.f32 %v1959_v20, %v366_v19  ;;  %v2042_v19 = vld [vmem:[%s2384_s5 + $0x8] sm:$0xff] }
  0x85   :  { %1029 = vmatpush.bf16.msra.mxu2 %v2042_v19 }
  0x86   :  { %1695 = vmatmul.msk.bf16.gmra.mxu0 %vm256_vm1, %v1791_v18  ;;  %v526_v24 = vmax.f32 %v367_v21, 0.0  ;;  %v2049_v21 = vld [vmem:[%s2384_s5] sm:$0xff] }
  0x89   :  { %1030 = vmatpush.bf16.msra.mxu2 %v2049_v21 }
  0x8b   :  { %v368_v22 = vpop.f32.mrf.mxu0 }
  0x8c   :  { %v369_v23 = vadd.f32 %v1959_v20, %v368_v22 }
  0x8e   :  { %v527_v25 = vmax.f32 %v369_v23, 0.0 }
  0x90   :  { %v590_v26 = vpack.c.bf16 %v527_v25, %v526_v24 }
  0x92   :  { %698 = vmatmul.bf16.vlgmr.msra.gmra.mxu1 %v590_v26 }
  0x93   :  { %v371_v28 = vpop.f32.mrf.mxu0 }
  0x94   :  { %v372_v29 = vadd.f32 %v1959_v20, %v371_v28  ;;  %v1799_v28 = vld [vmem:[%s2380_s0 + $0x80] sm:$0xff] }
  0x96   :  { %1696 = vmatmul.msk.bf16.gmra.mxu0 %vm256_vm1, %v1792_v27  ;;  %v528_v32 = vmax.f32 %v372_v29, 0.0 }
  0x9b   :  { %v373_v30 = vpop.f32.mrf.mxu0 }
  0x9c   :  { %v374_v31 = vadd.f32 %v1959_v20, %v373_v30 }
  0x9e   :  { %v529_v33 = vmax.f32 %v374_v31, 0.0 }
  0xa0   :  { %v591_v34 = vpack.c.bf16 %v529_v33, %v528_v32 }
  0xa2   :  { %703 = vmatmul.bf16.gmra.mxu1 %v591_v34 }
  0xa3   :  { %v376_v36 = vpop.f32.mrf.mxu0 }
  0xa4   :  { %v377_v37 = vadd.f32 %v1959_v20, %v376_v36 }
  0xa6   :  { %1697 = vmatmul.msk.bf16.gmra.mxu0 %vm256_vm1, %v1793_v35  ;;  %v530_v40 = vmax.f32 %v377_v37, 0.0  ;;  %v2063_v37 = vld [vmem:[%s2383_s4] ss:$0 sm:$0xff] }
  0xab   :  { %v378_v38 = vpop.f32.mrf.mxu0 }
  0xac   :  { %v379_v39 = vadd.f32 %v1959_v20, %v378_v38  ;;  %v1800_v38 = vld [vmem:[%s2380_s0 + $0x88] sm:$0xff] }
  0xae   :  { %v531_v41 = vmax.f32 %v379_v39, 0.0 }
  0xb0   :  { %v592_v42 = vpack.c.bf16 %v531_v41, %v530_v40 }
  0xb2   :  { %708 = vmatmul.bf16.gmra.mxu1 %v592_v42 }
  0xb3   :  { %v381_v44 = vpop.f32.mrf.mxu0 }
  0xb4   :  { %v382_v45 = vadd.f32 %v1959_v20, %v381_v44 }
  0xb6   :  { %1698 = vmatmul.msk.bf16.gmra.mxu0 %vm256_vm1, %v1794_v43  ;;  %v532_v48 = vmax.f32 %v382_v45, 0.0 }
  0xbb   :  { %v383_v46 = vpop.f32.mrf.mxu0 }
  0xbc   :  { %v384_v47 = vadd.f32 %v1959_v20, %v383_v46 }
  0xbe   :  { %v533_v49 = vmax.f32 %v384_v47, 0.0 }
  0xc0   :  { %v593_v50 = vpack.c.bf16 %v533_v49, %v532_v48 }
  0xc2   :  { %713 = vmatmul.bf16.gmra.mxu1 %v593_v50 }
  0xc3   :  { %v386_v52 = vpop.f32.mrf.mxu0 }
  0xc4   :  { %v387_v53 = vadd.f32 %v1959_v20, %v386_v52 }
  0xc6   :  { %1699 = vmatmul.msk.bf16.gmra.mxu0 %vm256_vm1, %v1795_v51  ;;  %v534_v56 = vmax.f32 %v387_v53, 0.0  ;;  %v1801_v53 = vld [vmem:[%s2380_s0 + $0x90] sm:$0xff] }
  0xcb   :  { %v388_v54 = vpop.f32.mrf.mxu0 }
  0xcc   :  { %v389_v55 = vadd.f32 %v1959_v20, %v388_v54 }
  0xce   :  { %v535_v57 = vmax.f32 %v389_v55, 0.0 }
  0xd0   :  { %v594_v58 = vpack.c.bf16 %v535_v57, %v534_v56 }
  0xd2   :  { %718 = vmatmul.bf16.gmra.mxu1 %v594_v58 }
  0xd3   :  { %v391_v60 = vpop.f32.mrf.mxu0 }
  0xd4   :  { %v392_v61 = vadd.f32 %v1959_v20, %v391_v60 }
  0xd6   :  { %1700 = vmatmul.msk.bf16.gmra.mxu0 %vm256_vm1, %v1796_v59  ;;  %v536_v1 = vmax.f32 %v392_v61, 0.0 }
  0xdb   :  { %v393_v62 = vpop.f32.mrf.mxu0 }
  0xdc   :  { %v394_v63 = vadd.f32 %v1959_v20, %v393_v62 }
  0xde   :  { %v537_v2 = vmax.f32 %v394_v63, 0.0 }
  0xe0   :  { %v595_v3 = vpack.c.bf16 %v537_v2, %v536_v1 }
  0xe2   :  { %723 = vmatmul.bf16.gmra.mxu1 %v595_v3 }
  0xe3   :  { %v396_v6 = vpop.f32.mrf.mxu0 }
  0xe4   :  { %v397_v9 = vadd.f32 %v1959_v20, %v396_v6  ;;  %v1802_v6 = vld [vmem:[%s2380_s0 + $0x98] sm:$0xff] }
  0xe6   :  { %1701 = vmatmul.msk.bf16.gmra.mxu0 %vm256_vm1, %v1797_v5  ;;  %v538_v13 = vmax.f32 %v397_v9, 0.0 }
  0xeb   :  { %v398_v10 = vpop.f32.mrf.mxu0 }
  0xec   :  { %v399_v11 = vadd.f32 %v1959_v20, %v398_v10 }
  0xee   :  { %v539_v14 = vmax.f32 %v399_v11, 0.0 }
  0xf0   :  { %v596_v15 = vpack.c.bf16 %v539_v14, %v538_v13 }
  0xf2   :  { %728 = vmatmul.bf16.gmra.mxu1 %v596_v15 }
  0xf3   :  { %v401_v18 = vpop.f32.mrf.mxu0 }
  0xf4   :  { %v402_v22 = vadd.f32 %v1959_v20, %v401_v18 }
  0xf6   :  { %1702 = vmatmul.msk.bf16.gmra.mxu0 %vm256_vm1, %v1798_v17  ;;  %v540_v25 = vmax.f32 %v402_v22, 0.0 }
  0xfb   :  { %v403_v23 = vpop.f32.mrf.mxu0 }
  0xfc   :  { %v404_v24 = vadd.f32 %v1959_v20, %v403_v23 }
  0xfe   :  { %v541_v26 = vmax.f32 %v404_v24, 0.0 }
 0x100   :  { %v597_v27 = vpack.c.bf16 %v541_v26, %v540_v25 }
 0x102   :  { %733 = vmatmul.bf16.gmra.mxu1 %v597_v27 }
 0x103   :  { %v406_v29 = vpop.f32.mrf.mxu0 }
 0x104   :  { %v407_v30 = vadd.f32 %v1959_v20, %v406_v29 }
 0x106   :  { %1703 = vmatmul.msk.bf16.gmra.mxu0 %vm256_vm1, %v1799_v28  ;;  %v542_v33 = vmax.f32 %v407_v30, 0.0  ;;  %v1803_v28 = vld [vmem:[%s2380_s0 + $0xa0] sm:$0xff] }
 0x10b   :  { %v408_v31 = vpop.f32.mrf.mxu0 }
 0x10c   :  { %v409_v32 = vadd.f32 %v1959_v20, %v408_v31 }
 0x10e   :  { %v543_v34 = vmax.f32 %v409_v32, 0.0 }
 0x10f   :  { %v699_v35 = vpop.f32.mrf.mxu1 }
 0x110   :  { %v598_v36 = vpack.c.bf16 %v543_v34, %v542_v33  ;;  %v700_v40 = vadd.f32 %v2063_v37, %v699_v35 }
 0x112   :  { %738 = vmatmul.bf16.gmra.mxu1 %v598_v36  ;;  %v859_v43 = vmax.f32 %v700_v40, 0.0 }
 0x113   :  { %v411_v39 = vpop.f32.mrf.mxu0 }
 0x114   :  { %v412_v44 = vadd.f32 %v1959_v20, %v411_v39 }
 0x116   :  { %1704 = vmatmul.msk.bf16.gmra.mxu0 %vm256_vm1, %v1800_v38  ;;  %v544_v49 = vmax.f32 %v412_v44, 0.0  ;;  %v1804_v44 = vld [vmem:[%s2380_s0 + $0xa8] sm:$0xff] }
 0x117   :  { %v701_v41 = vpop.f32.mrf.mxu1 }
 0x118   :  { %v702_v42 = vadd.f32 %v2063_v37, %v701_v41 }
 0x11a   :  { %v860_v45 = vmax.f32 %v702_v42, 0.0 }
 0x11b   :  { %v413_v46 = vpop.f32.mrf.mxu0 }
 0x11c   :  { %v414_v47 = vadd.f32 %v1959_v20, %v413_v46  ;;  %v923_v48 = vpack.c.bf16 %v860_v45, %v859_v43 }
 0x11e   :  { %v545_v50 = vmax.f32 %v414_v47, 0.0  ;;  %1031 = vmatmul.bf16.vlgmr.msra.gmra.mxu2 %v923_v48 }
 0x11f   :  { %v704_v51 = vpop.f32.mrf.mxu1 }
 0x120   :  { %v599_v52 = vpack.c.bf16 %v545_v50, %v544_v49  ;;  %v705_v55 = vadd.f32 %v2063_v37, %v704_v51 }
 0x122   :  { %743 = vmatmul.bf16.gmra.mxu1 %v599_v52  ;;  %v861_v58 = vmax.f32 %v705_v55, 0.0 }
 0x123   :  { %v416_v54 = vpop.f32.mrf.mxu0 }
 0x124   :  { %v417_v59 = vadd.f32 %v1959_v20, %v416_v54 }
 0x126   :  { %1705 = vmatmul.msk.bf16.gmra.mxu0 %vm256_vm1, %v1801_v53  ;;  %v546_v1 = vmax.f32 %v417_v59, 0.0  ;;  %v1805_v59 = vld [vmem:[%s2380_s0 + $0xb0] sm:$0xff] }
 0x127   :  { %v706_v56 = vpop.f32.mrf.mxu1 }
 0x128   :  { %v707_v57 = vadd.f32 %v2063_v37, %v706_v56 }
 0x12a   :  { %v862_v60 = vmax.f32 %v707_v57, 0.0 }
 0x12b   :  { %v418_v61 = vpop.f32.mrf.mxu0 }
 0x12c   :  { %v419_v62 = vadd.f32 %v1959_v20, %v418_v61  ;;  %v924_v63 = vpack.c.bf16 %v862_v60, %v861_v58 }
 0x12e   :  { %v547_v2 = vmax.f32 %v419_v62, 0.0  ;;  %1036 = vmatmul.bf16.gmra.mxu2 %v924_v63  ;;  %v1808_v62 = vld [vmem:[%s2380_s0 + $0xc8] sm:$0xff] }
 0x12f   :  { %v709_v3 = vpop.f32.mrf.mxu1  ;;  %1712 = vmatmul.msk.bf16.vlgmr.msra.gmra.mxu3 %vm256_vm1, %v1808_v62  ;;  %v2160_v62 = vld [vmem:[%s2385_s6] ss:$0 sm:$0xff] }
 0x130   :  { %v600_v5 = vpack.c.bf16 %v547_v2, %v546_v1  ;;  %v710_v10 = vadd.f32 %v2063_v37, %v709_v3  ;;  %1840 = vmatpush.bf16.msra.mxu3 %v1997_v0  ;;  %v1806_v0 = vld [vmem:[%s2380_s0 + $0xb8] sm:$0xff] }
 0x132   :  { %748 = vmatmul.bf16.gmra.mxu1 %v600_v5  ;;  %v863_v14 = vmax.f32 %v710_v10, 0.0 }
 0x133   :  { %v421_v9 = vpop.f32.mrf.mxu0 }
 0x134   :  { %v422_v15 = vadd.f32 %v1959_v20, %v421_v9  ;;  %1841 = vmatpush.bf16.msra.mxu3 %v2003_v4  ;;  %v1809_v4 = vld [vmem:[%s2380_s0 + $0xd0] sm:$0xff] }
 0x136   :  { %1706 = vmatmul.msk.bf16.gmra.mxu0 %vm256_vm1, %v1802_v6  ;;  %v548_v24 = vmax.f32 %v422_v15, 0.0 }
 0x137   :  { %v711_v11 = vpop.f32.mrf.mxu1 }
 0x138   :  { %v712_v13 = vadd.f32 %v2063_v37, %v711_v11  ;;  %1842 = vmatpush.bf16.msra.mxu3 %v2012_v7 }
 0x13a   :  { %v864_v17 = vmax.f32 %v712_v13, 0.0 }
 0x13b   :  { %v423_v18 = vpop.f32.mrf.mxu0 }
 0x13c   :  { %v424_v22 = vadd.f32 %v1959_v20, %v423_v18  ;;  %v925_v23 = vpack.c.bf16 %v864_v17, %v863_v14  ;;  %1843 = vmatpush.bf16.msra.mxu3 %v2019_v8 }
 0x13e   :  { %v549_v25 = vmax.f32 %v424_v22, 0.0  ;;  %1041 = vmatmul.bf16.gmra.mxu2 %v925_v23 }
 0x13f   :  { %v714_v26 = vpop.f32.mrf.mxu1  ;;  %1713 = vmatmul.msk.bf16.gmra.mxu3 %vm256_vm1, %v1809_v4 }
 0x140   :  { %v601_v27 = vpack.c.bf16 %v549_v25, %v548_v24  ;;  %v715_v30 = vadd.f32 %v2063_v37, %v714_v26  ;;  %1844 = vmatpush.bf16.msra.mxu3 %v2027_v12  ;;  %v1807_v12 = vld [vmem:[%s2380_s0 + $0xc0] sm:$0xff] }
 0x142   :  { %753 = vmatmul.bf16.gmra.mxu1 %v601_v27  ;;  %v865_v33 = vmax.f32 %v715_v30, 0.0 }
 0x143   :  { %v426_v29 = vpop.f32.mrf.mxu0 }
 0x144   :  { %v427_v34 = vadd.f32 %v1959_v20, %v426_v29  ;;  %1845 = vmatpush.bf16.msra.mxu3 %v2033_v16  ;;  %v1810_v16 = vld [vmem:[%s2380_s0 + $0xd8] sm:$0xff] }
 0x146   :  { %1707 = vmatmul.msk.bf16.gmra.mxu0 %vm256_vm1, %v1803_v28  ;;  %v550_v40 = vmax.f32 %v427_v34, 0.0 }
 0x147   :  { %v716_v31 = vpop.f32.mrf.mxu1 }
 0x148   :  { %v717_v32 = vadd.f32 %v2063_v37, %v716_v31  ;;  %1846 = vmatpush.bf16.msra.mxu3 %v2042_v19 }
 0x14a   :  { %v866_v35 = vmax.f32 %v717_v32, 0.0 }
 0x14b   :  { %v428_v36 = vpop.f32.mrf.mxu0 }
 0x14c   :  { %v429_v38 = vadd.f32 %v1959_v20, %v428_v36  ;;  %v926_v39 = vpack.c.bf16 %v866_v35, %v865_v33  ;;  %1847 = vmatpush.bf16.msra.mxu3 %v2049_v21 }
 0x14e   :  { %v551_v41 = vmax.f32 %v429_v38, 0.0  ;;  %1046 = vmatmul.bf16.gmra.mxu2 %v926_v39 }
 0x14f   :  { %v719_v42 = vpop.f32.mrf.mxu1  ;;  %1714 = vmatmul.msk.bf16.gmra.mxu3 %vm256_vm1, %v1810_v16 }
 0x150   :  { %v602_v43 = vpack.c.bf16 %v551_v41, %v550_v40  ;;  %v720_v46 = vadd.f32 %v2063_v37, %v719_v42 }
 0x152   :  { %758 = vmatmul.bf16.gmra.mxu1 %v602_v43  ;;  %v867_v49 = vmax.f32 %v720_v46, 0.0 }
 0x153   :  { %v431_v45 = vpop.f32.mrf.mxu0 }
 0x154   :  { %v432_v50 = vadd.f32 %v1959_v20, %v431_v45 }
 0x156   :  { %1708 = vmatmul.msk.bf16.gmra.mxu0 %vm256_vm1, %v1804_v44  ;;  %v552_v55 = vmax.f32 %v432_v50, 0.0 }
 0x157   :  { %v721_v47 = vpop.f32.mrf.mxu1 }
 0x158   :  { %v722_v48 = vadd.f32 %v2063_v37, %v721_v47  ;;  %v1811_v47 = vld [vmem:[%s2380_s0 + $0xe0] sm:$0xff] }
 0x15a   :  { %v868_v51 = vmax.f32 %v722_v48, 0.0 }
 0x15b   :  { %v433_v52 = vpop.f32.mrf.mxu0 }
 0x15c   :  { %v434_v53 = vadd.f32 %v1959_v20, %v433_v52  ;;  %v927_v54 = vpack.c.bf16 %v868_v51, %v867_v49 }
 0x15e   :  { %v553_v56 = vmax.f32 %v434_v53, 0.0  ;;  %1051 = vmatmul.bf16.gmra.mxu2 %v927_v54 }
 0x15f   :  { %v724_v57 = vpop.f32.mrf.mxu1  ;;  %1715 = vmatmul.msk.bf16.gmra.mxu3 %vm256_vm1, %v1811_v47 }
 0x160   :  { %v603_v58 = vpack.c.bf16 %v553_v56, %v552_v55  ;;  %v725_v61 = vadd.f32 %v2063_v37, %v724_v57 }
 0x162   :  { %763 = vmatmul.bf16.gmra.mxu1 %v603_v58  ;;  %v869_v2 = vmax.f32 %v725_v61, 0.0 }
 0x163   :  { %v436_v60 = vpop.f32.mrf.mxu0 }
 0x164   :  { %v437_v3 = vadd.f32 %v1959_v20, %v436_v60 }
 0x166   :  { %1709 = vmatmul.msk.bf16.gmra.mxu0 %vm256_vm1, %v1805_v59  ;;  %v554_v11 = vmax.f32 %v437_v3, 0.0 }
 0x167   :  { %v726_v63 = vpop.f32.mrf.mxu1 }
 0x168   :  { %v727_v1 = vadd.f32 %v2063_v37, %v726_v63 }
 0x16a   :  { %v870_v5 = vmax.f32 %v727_v1, 0.0  ;;  %v1812_v1 = vld [vmem:[%s2380_s0 + $0xe8] sm:$0xff] }
 0x16b   :  { %v438_v6 = vpop.f32.mrf.mxu0 }
 0x16c   :  { %v439_v9 = vadd.f32 %v1959_v20, %v438_v6  ;;  %v928_v10 = vpack.c.bf16 %v870_v5, %v869_v2 }
 0x16e   :  { %v555_v13 = vmax.f32 %v439_v9, 0.0  ;;  %1056 = vmatmul.bf16.gmra.mxu2 %v928_v10 }
 0x16f   :  { %v729_v14 = vpop.f32.mrf.mxu1  ;;  %1716 = vmatmul.msk.bf16.gmra.mxu3 %vm256_vm1, %v1812_v1 }
 0x170   :  { %v604_v15 = vpack.c.bf16 %v555_v13, %v554_v11  ;;  %v730_v18 = vadd.f32 %v2063_v37, %v729_v14 }
 0x172   :  { %768 = vmatmul.bf16.gmra.mxu1 %v604_v15  ;;  %v871_v7 = vmax.f32 %v730_v18, 0.0 }
 0x173   :  { %v441_v17 = vpop.f32.mrf.mxu0 }
 0x174   :  { %v442_v24 = vadd.f32 %v1959_v20, %v441_v17 }
 0x176   :  { %1710 = vmatmul.msk.bf16.gmra.mxu0 %vm256_vm1, %v1806_v0  ;;  %v556_v28 = vmax.f32 %v442_v24, 0.0 }
 0x177   :  { %v731_v22 = vpop.f32.mrf.mxu1 }
 0x178   :  { %v732_v23 = vadd.f32 %v2063_v37, %v731_v22 }
 0x17a   :  { %v872_v25 = vmax.f32 %v732_v23, 0.0 }
 0x17b   :  { %v443_v8 = vpop.f32.mrf.mxu0 }
 0x17c   :  { %v444_v26 = vadd.f32 %v1959_v20, %v443_v8  ;;  %v929_v27 = vpack.c.bf16 %v872_v25, %v871_v7 }
 0x17e   :  { %v557_v29 = vmax.f32 %v444_v26, 0.0  ;;  %1061 = vmatmul.bf16.gmra.mxu2 %v929_v27 }
 0x17f   :  { %v734_v30 = vpop.f32.mrf.mxu1 }
 0x180   :  { %v605_v31 = vpack.c.bf16 %v557_v29, %v556_v28  ;;  %v735_v33 = vadd.f32 %v2063_v37, %v734_v30  ;;  %v1813_v28 = vld [vmem:[%s2380_s0 + $0xf0] sm:$0xff] }
 0x181   :  { %1717 = vmatmul.msk.bf16.gmra.mxu3 %vm256_vm1, %v1813_v28 }
 0x182   :  { %773 = vmatmul.bf16.gmra.mxu1 %v605_v31  ;;  %v873_v19 = vmax.f32 %v735_v33, 0.0 }
 0x183   :  { %v446_v32 = vpop.f32.mrf.mxu0 }
 0x184   :  { %v447_v36 = vadd.f32 %v1959_v20, %v446_v32 }
 0x186   :  { %1711 = vmatmul.msk.bf16.gmra.mxu0 %vm256_vm1, %v1807_v12  ;;  %v558_v41 = vmax.f32 %v447_v36, 0.0 }
 0x187   :  { %v736_v34 = vpop.f32.mrf.mxu1 }
 0x188   :  { %v737_v35 = vadd.f32 %v2063_v37, %v736_v34 }
 0x18a   :  { %v874_v38 = vmax.f32 %v737_v35, 0.0 }
 0x18b   :  { %v448_v39 = vpop.f32.mrf.mxu0 }
 0x18c   :  { %v449_v21 = vadd.f32 %v1959_v20, %v448_v39  ;;  %v930_v40 = vpack.c.bf16 %v874_v38, %v873_v19 }
 0x18e   :  { %v559_v42 = vmax.f32 %v449_v21, 0.0  ;;  %1066 = vmatmul.bf16.gmra.mxu2 %v930_v40 }
 0x18f   :  { %v739_v43 = vpop.f32.mrf.mxu1 }
 0x190   :  { %v606_v44 = vpack.c.bf16 %v559_v42, %v558_v41  ;;  %v740_v46 = vadd.f32 %v2063_v37, %v739_v43 }
 0x192   :  { %778 = vmatmul.bf16.gmra.mxu1 %v606_v44  ;;  %v875_v50 = vmax.f32 %v740_v46, 0.0 }
 0x193   :  { %v451_v45 = vpop.f32.mrf.mxu0 }
 0x194   :  { %v452_v51 = vadd.f32 %v1959_v20, %v451_v45 }
 0x196   :  { %v560_v56 = vmax.f32 %v452_v51, 0.0 }
 0x197   :  { %v741_v48 = vpop.f32.mrf.mxu1 }
 0x198   :  { %v742_v49 = vadd.f32 %v2063_v37, %v741_v48 }
 0x19a   :  { %v876_v52 = vmax.f32 %v742_v49, 0.0 }
 0x19b   :  { %v453_v53 = vpop.f32.mrf.mxu0 }
 0x19c   :  { %v454_v54 = vadd.f32 %v1959_v20, %v453_v53  ;;  %v931_v55 = vpack.c.bf16 %v876_v52, %v875_v50 }
 0x19e   :  { %v561_v57 = vmax.f32 %v454_v54, 0.0  ;;  %1071 = vmatmul.bf16.gmra.mxu2 %v931_v55  ;;  %v1814_v55 = vld [vmem:[%s2380_s0 + $0xf8] sm:$0xff] }
 0x19f   :  { %v744_v58 = vpop.f32.mrf.mxu1  ;;  %1718 = vmatmul.msk.bf16.gmra.mxu3 %vm256_vm1, %v1814_v55 }
 0x1a0   :  { %v607_v59 = vpack.c.bf16 %v561_v57, %v560_v56  ;;  %v745_v63 = vadd.f32 %v2063_v37, %v744_v58 }
 0x1a1   :  { %v1032_v60 = vpop.f32.mrf.mxu2 }
 0x1a2   :  { %783 = vmatmul.bf16.gmra.mxu1 %v607_v59  ;;  %v1033_v3 = vadd.f32 %v2160_v62, %v1032_v60  ;;  %v877_v9 = vmax.f32 %v745_v63, 0.0 }
 0x1a3   :  { %v456_v61 = vpop.f32.mrf.mxu0 }
 0x1a4   :  { %v457_v10 = vadd.f32 %v1959_v20, %v456_v61  ;;  %v1192_v15 = vmax.f32 %v1033_v3, 0.0 }
 0x1a6   :  { %v562_v4 = vmax.f32 %v457_v10, 0.0 }
 0x1a7   :  { %v746_v2 = vpop.f32.mrf.mxu1 }
 0x1a8   :  { %v747_v5 = vadd.f32 %v2063_v37, %v746_v2 }
 0x1a9   :  { %v1034_v6 = vpop.f32.mrf.mxu2 }
 0x1aa   :  { %v878_v11 = vmax.f32 %v747_v5, 0.0  ;;  %v1035_v13 = vadd.f32 %v2160_v62, %v1034_v6 }
 0x1ab   :  { %v458_v14 = vpop.f32.mrf.mxu0 }
 0x1ac   :  { %v1193_v0 = vmax.f32 %v1035_v13, 0.0  ;;  %v459_v17 = vadd.f32 %v1959_v20, %v458_v14  ;;  %v932_v18 = vpack.c.bf16 %v878_v11, %v877_v9 }
 0x1ae   :  { %v1256_v22 = vmax.f32 %v1192_v15, %v1193_v0  ;;  %v563_v23 = vmax.f32 %v459_v17, 0.0  ;;  %1076 = vmatmul.bf16.gmra.mxu2 %v932_v18 }
 0x1af   :  { %v749_v7 = vpop.f32.mrf.mxu1 }
 0x1b0   :  { %v608_v24 = vpack.c.bf16 %v563_v23, %v562_v4  ;;  %v1257_v26 = vrot.slane %v1256_v22, 4  ;;  %v750_v27 = vadd.f32 %v2063_v37, %v749_v7 }
 0x1b1   :  { %v1037_v25 = vpop.f32.mrf.mxu2 }
 0x1b2   :  { %788 = vmatmul.bf16.gmra.mxu1 %v608_v24  ;;  %v1038_v30 = vadd.f32 %v2160_v62, %v1037_v25  ;;  %v1258_v12 = vmax.f32 %v1256_v22, %v1257_v26  ;;  %v879_v33 = vmax.f32 %v750_v27, 0.0 }
 0x1b3   :  { %v461_v8 = vpop.f32.mrf.mxu0 }
 0x1b4   :  { %v462_v16 = vadd.f32 %v1959_v20, %v461_v8  ;;  %v1194_v36 = vmax.f32 %v1038_v30, 0.0  ;;  %v1259_v40 = vrot.slane %v1258_v12, 2 }
 0x1b6   :  { %v564_v41 = vmax.f32 %v462_v16, 0.0  ;;  %v1260_v47 = vmax.f32 %v1258_v12, %v1259_v40 }
 0x1b7   :  { %v751_v29 = vpop.f32.mrf.mxu1 }
 0x1b8   :  { %v752_v31 = vadd.f32 %v2063_v37, %v751_v29  ;;  %v1261_v52 = vrot.slane %v1260_v47, 1 }
 0x1b9   :  { %v1039_v32 = vpop.f32.mrf.mxu2 }
 0x1ba   :  { %v880_v34 = vmax.f32 %v752_v31, 0.0  ;;  %v1040_v35 = vadd.f32 %v2160_v62, %v1039_v32  ;;  %v1262_v60 = vmax.f32 %v1260_v47, %v1261_v52 }
 0x1bb   :  { %v463_v19 = vpop.f32.mrf.mxu0 }
 0x1bc   :  { %v1195_v38 = vmax.f32 %v1040_v35, 0.0  ;;  %v464_v39 = vadd.f32 %v1959_v20, %v463_v19  ;;  %v933_v21 = vpack.c.bf16 %v880_v34, %v879_v33 }
 0x1be   :  { %v1263_v42 = vmax.f32 %v1194_v36, %v1195_v38  ;;  %v565_v43 = vmax.f32 %v464_v39, 0.0  ;;  %1081 = vmatmul.bf16.gmra.mxu2 %v933_v21 }
 0x1bf   :  { %v754_v44 = vpop.f32.mrf.mxu1 }
 0x1c0   :  { %v1264_v45 = vrot.slane %v1263_v42, 4  ;;  %v609_v46 = vpack.c.bf16 %v565_v43, %v564_v41  ;;  %v755_v53 = vadd.f32 %v2063_v37, %v754_v44 }
 0x1c1   :  { %v1042_v48 = vpop.f32.mrf.mxu2 }
 0x1c2   :  { %v1265_v49 = vmax.f32 %v1263_v42, %v1264_v45  ;;  %793 = vmatmul.bf16.gmra.mxu1 %v609_v46  ;;  %v1043_v56 = vadd.f32 %v2160_v62, %v1042_v48  ;;  %v881_v61 = vmax.f32 %v755_v53, 0.0 }
 0x1c3   :  { %v466_v50 = vpop.f32.mrf.mxu0 }
 0x1c4   :  { %v1266_v51 = vrot.slane %v1265_v49, 2  ;;  %v467_v2 = vadd.f32 %v1959_v20, %v466_v50  ;;  %v1196_v6 = vmax.f32 %v1043_v56, 0.0 }
 0x1c6   :  { %v1267_v54 = vmax.f32 %v1265_v49, %v1266_v51  ;;  %v566_v15 = vmax.f32 %v467_v2, 0.0 }
 0x1c7   :  { %v756_v57 = vpop.f32.mrf.mxu1 }
 0x1c8   :  { %v1268_v58 = vrot.slane %v1267_v54, 1  ;;  %v757_v59 = vadd.f32 %v2063_v37, %v756_v57 }
 0x1c9   :  { %v1044_v63 = vpop.f32.mrf.mxu2 }
 0x1ca   :  { %v1269_v1 = vmax.f32 %v1267_v54, %v1268_v58  ;;  %v882_v3 = vmax.f32 %v757_v59, 0.0  ;;  %v1045_v5 = vadd.f32 %v2160_v62, %v1044_v63 }
 0x1cb   :  { %v468_v9 = vpop.f32.mrf.mxu0 }
 0x1cc   :  { %v1513_v10 = vsel %vm1512_vm2, %v1269_v1, %v1262_v60  ;;  %v1197_v11 = vmax.f32 %v1045_v5, 0.0  ;;  %v469_v13 = vadd.f32 %v1959_v20, %v468_v9  ;;  %v934_v14 = vpack.c.bf16 %v882_v3, %v881_v61 }
 0x1ce   :  { %v1270_v0 = vmax.f32 %v1196_v6, %v1197_v11  ;;  %v567_v17 = vmax.f32 %v469_v13, 0.0  ;;  %1086 = vmatmul.bf16.gmra.mxu2 %v934_v14  ;;  %v491_v11 = vpop.f32.mrf.mxu3 }
 0x1cf   :  { %v759_v18 = vpop.f32.mrf.mxu1 }
 0x1d0   :  { %v1271_v4 = vrot.slane %v1270_v0, 4  ;;  %v610_v22 = vpack.c.bf16 %v567_v17, %v566_v15  ;;  %v760_v8 = vadd.f32 %v2063_v37, %v759_v18 }
 0x1d1   :  { %v1047_v23 = vpop.f32.mrf.mxu2 }
 0x1d2   :  { %v1272_v7 = vmax.f32 %v1270_v0, %v1271_v4  ;;  %798 = vmatmul.bf16.gmra.mxu1 %v610_v22  ;;  %v1048_v27 = vadd.f32 %v2160_v62, %v1047_v23  ;;  %v883_v31 = vmax.f32 %v760_v8, 0.0 }
 0x1d3   :  { %v471_v24 = vpop.f32.mrf.mxu0 }
 0x1d4   :  { %v1273_v25 = vrot.slane %v1272_v7, 2  ;;  %v472_v33 = vadd.f32 %v1959_v20, %v471_v24  ;;  %v1198_v35 = vmax.f32 %v1048_v27, 0.0 }
 0x1d6   :  { %v1274_v26 = vmax.f32 %v1272_v7, %v1273_v25  ;;  %v568_v40 = vmax.f32 %v472_v33, 0.0  ;;  %v493_v24 = vpop.f32.mrf.mxu3 }
 0x1d7   :  { %v761_v28 = vpop.f32.mrf.mxu1 }
 0x1d8   :  { %v1275_v29 = vrot.slane %v1274_v26, 1  ;;  %v762_v30 = vadd.f32 %v2063_v37, %v761_v28 }
 0x1d9   :  { %v1049_v12 = vpop.f32.mrf.mxu2 }
 0x1da   :  { %v1276_v32 = vmax.f32 %v1274_v26, %v1275_v29  ;;  %v884_v16 = vmax.f32 %v762_v30, 0.0  ;;  %v1050_v34 = vadd.f32 %v2160_v62, %v1049_v12 }
 0x1db   :  { %v473_v19 = vpop.f32.mrf.mxu0 }
 0x1dc   :  { %v1515_v36 = vsel %vm1514_vm3, %v1276_v32, %v1513_v10  ;;  %v935_v38 = vpack.c.bf16 %v884_v16, %v883_v31  ;;  %v1199_v39 = vmax.f32 %v1050_v34, 0.0  ;;  %v474_v21 = vadd.f32 %v1959_v20, %v473_v19 }
 0x1de   :  { %v1277_v41 = vmax.f32 %v1198_v35, %v1199_v39  ;;  %v569_v42 = vmax.f32 %v474_v21, 0.0  ;;  %1091 = vmatmul.bf16.gmra.mxu2 %v935_v38  ;;  %v2216_v35 = vpop.f32.mrf.mxu3 }
 0x1df   :  { %v764_v43 = vpop.f32.mrf.mxu1 }
 0x1e0   :  { %v1278_v44 = vrot.slane %v1277_v41, 4  ;;  %v611_v45 = vpack.c.bf16 %v569_v42, %v568_v40  ;;  %v765_v51 = vadd.f32 %v2063_v37, %v764_v43 }
 0x1e1   :  { %v1052_v46 = vpop.f32.mrf.mxu2 }
 0x1e2   :  { %v1279_v47 = vmax.f32 %v1277_v41, %v1278_v44  ;;  %803 = vmatmul.bf16.gmra.mxu1 %v611_v45  ;;  %v885_v57 = vmax.f32 %v765_v51, 0.0  ;;  %v1053_v31 = vadd.f32 %v2160_v62, %v1052_v46 }
 0x1e3   :  { %v476_v48 = vpop.f32.mrf.mxu0 }
 0x1e4   :  { %v1280_v49 = vrot.slane %v1279_v47, 2  ;;  %v477_v58 = vadd.f32 %v1959_v20, %v476_v48 }
 0x1e6   :  { %v1281_v50 = vmax.f32 %v1279_v47, %v1280_v49  ;;  %v570_v2 = vmax.f32 %v477_v58, 0.0 }
 0x1e7   :  { %v766_v52 = vpop.f32.mrf.mxu1 }
 0x1e8   :  { %v1282_v53 = vrot.slane %v1281_v50, 1  ;;  %v767_v54 = vadd.f32 %v2063_v37, %v766_v52 }
 0x1e9   :  { %v1054_v55 = vpop.f32.mrf.mxu2 }
 0x1ea   :  { %v1283_v56 = vmax.f32 %v1281_v50, %v1282_v53  ;;  %v886_v59 = vmax.f32 %v767_v54, 0.0  ;;  %v1055_v29 = vadd.f32 %v2160_v62, %v1054_v55 }
 0x1eb   :  { %v478_v60 = vpop.f32.mrf.mxu0 }
 0x1ec   :  { %v2204_v61 = vsel %vm1516_vm4, %v1283_v56, %v1515_v36  ;;  %v936_v63 = vpack.c.bf16 %v886_v59, %v885_v57  ;;  %v479_v1 = vadd.f32 %v1959_v20, %v478_v60  ;;  %v1201_v33 = vmax.f32 %v1055_v29, 0.0  ;;  %v498_v60 = vpop.f32.mrf.mxu3 }
 0x1ed   :  { %v1200_v36 = vmax.f32 %v1053_v31, 0.0 }
 0x1ee   :  { %v571_v3 = vmax.f32 %v479_v1, 0.0  ;;  %1096 = vmatmul.bf16.gmra.mxu2 %v936_v63 }
 0x1ef   :  { %v769_v5 = vpop.f32.mrf.mxu1  ;;  %v1284_v44 = vmax.f32 %v1200_v36, %v1201_v33 }
 0x1f0   :  { %v612_v6 = vpack.c.bf16 %v571_v3, %v570_v2  ;;  %v770_v13 = vadd.f32 %v2063_v37, %v769_v5 }
 0x1f1   :  { %v1057_v9 = vpop.f32.mrf.mxu2  ;;  %v1285_v54 = vrot.slane %v1284_v44, 4 }
 0x1f2   :  { %808 = vmatmul.bf16.gmra.mxu1 %v612_v6  ;;  %v887_v17 = vmax.f32 %v770_v13, 0.0  ;;  %v1058_v16 = vadd.f32 %v2160_v62, %v1057_v9  ;;  %v492_v9 = vadd.f32 %v1959_v20, %v491_v11 }
 0x1f3   :  { %v481_v10 = vpop.f32.mrf.mxu0  ;;  %v1286_v63 = vmax.f32 %v1284_v44, %v1285_v54 }
 0x1f4   :  { %v482_v18 = vadd.f32 %v1959_v20, %v481_v10  ;;  %v1202_v45 = vmax.f32 %v1058_v16, 0.0 }
 0x1f5   :  { %v1287_v5 = vrot.slane %v1286_v63, 2 }
 0x1f6   :  { %v572_v25 = vmax.f32 %v482_v18, 0.0 }
 0x1f7   :  { %v771_v14 = vpop.f32.mrf.mxu1 }
 0x1f8   :  { %v772_v15 = vadd.f32 %v2063_v37, %v771_v14  ;;  %v494_v14 = vadd.f32 %v1959_v20, %v493_v24 }
 0x1f9   :  { %v1059_v0 = vpop.f32.mrf.mxu2 }
 0x1fa   :  { %v888_v4 = vmax.f32 %v772_v15, 0.0  ;;  %v1060_v12 = vadd.f32 %v2160_v62, %v1059_v0 }
 0x1fb   :  { %v483_v22 = vpop.f32.mrf.mxu0 }
 0x1fc   :  { %v937_v23 = vpack.c.bf16 %v888_v4, %v887_v17  ;;  %v484_v7 = vadd.f32 %v1959_v20, %v483_v22  ;;  %v1203_v38 = vmax.f32 %v1060_v12, 0.0 }
 0x1fe   :  { %v573_v8 = vmax.f32 %v484_v7, 0.0  ;;  %1101 = vmatmul.bf16.gmra.mxu2 %v937_v23  ;;  %v1291_v50 = vmax.f32 %v1202_v45, %v1203_v38  ;;  %v1288_v23 = vmax.f32 %v1286_v63, %v1287_v5 }
 0x1ff   :  { %v774_v26 = vpop.f32.mrf.mxu1 }
 0x200   :  { %v613_v27 = vpack.c.bf16 %v573_v8, %v572_v25  ;;  %v775_v32 = vadd.f32 %v2063_v37, %v774_v26  ;;  %v1292_v58 = vrot.slane %v1291_v50, 4  ;;  %v576_v25 = vmax.f32 %v492_v9, 0.0  ;;  %v501_v8 = vpop.f32.mrf.mxu3 }
 0x201   :  { %v1062_v28 = vpop.f32.mrf.mxu2  ;;  %v1289_v31 = vrot.slane %v1288_v23, 1 }
 0x202   :  { %813 = vmatmul.bf16.gmra.mxu1 %v613_v27  ;;  %v1063_v39 = vadd.f32 %v2160_v62, %v1062_v28  ;;  %v889_v40 = vmax.f32 %v775_v32, 0.0  ;;  %v1293_v2 = vmax.f32 %v1291_v50, %v1292_v58  ;;  %v577_v27 = vmax.f32 %v494_v14, 0.0 }
 0x203   :  { %v486_v30 = vpop.f32.mrf.mxu0  ;;  %v1290_v36 = vmax.f32 %v1288_v23, %v1289_v31 }
 0x204   :  { %v487_v41 = vadd.f32 %v1959_v20, %v486_v30  ;;  %v1204_v51 = vmax.f32 %v1063_v39, 0.0  ;;  %v1294_v0 = vrot.slane %v1293_v2, 2  ;;  %v615_v32 = vpack.c.bf16 %v577_v27, %v576_v25 }
 0x206   :  { %v574_v52 = vmax.f32 %v487_v41, 0.0  ;;  %v1295_v29 = vmax.f32 %v1293_v2, %v1294_v0 }
 0x207   :  { %v776_v34 = vpop.f32.mrf.mxu1 }
 0x208   :  { %v777_v19 = vadd.f32 %v2063_v37, %v776_v34  ;;  %v1296_v33 = vrot.slane %v1295_v29, 1 }
 0x209   :  { %v1064_v21 = vpop.f32.mrf.mxu2 }
 0x20a   :  { %v890_v42 = vmax.f32 %v777_v19, 0.0  ;;  %v1065_v43 = vadd.f32 %v2160_v62, %v1064_v21  ;;  %v1297_v39 = vmax.f32 %v1295_v29, %v1296_v33  ;;  %v503_v21 = vpop.f32.mrf.mxu3 }
 0x20b   :  { %v488_v46 = vpop.f32.mrf.mxu0 }
 0x20c   :  { %v938_v47 = vpack.c.bf16 %v890_v42, %v889_v40  ;;  %v1205_v48 = vmax.f32 %v1065_v43, 0.0  ;;  %v489_v49 = vadd.f32 %v1959_v20, %v488_v46  ;;  %v2233_v43 = vld [vmem:[%s2381_s2] ss:$0 sm:$0xff] }
 0x20d   :  { %v497_v44 = vadd.f32 %v2233_v43, %v2216_v35  ;;  %v499_v45 = vadd.f32 %v2233_v43, %v498_v60  ;;  %v504_v0 = vadd.f32 %v2233_v43, %v503_v21 }
 0x20e   :  { %v575_v53 = vmax.f32 %v489_v49, 0.0  ;;  %1106 = vmatmul.bf16.gmra.mxu2 %v938_v47  ;;  %v1298_v55 = vmax.f32 %v1204_v51, %v1205_v48  ;;  %v1519_v47 = vsel %vm1518_vm5, %v1290_v36, %v2204_v61 }
 0x20f   :  { %v779_v56 = vpop.f32.mrf.mxu1  ;;  %v1521_v51 = vsel %vm1520_vm6, %v1297_v39, %v1519_v47  ;;  %v579_v58 = vmax.f32 %v499_v45, 0.0 }
 0x210   :  { %v614_v57 = vpack.c.bf16 %v575_v53, %v574_v52  ;;  %v1299_v1 = vrot.slane %v1298_v55, 4  ;;  %v780_v3 = vadd.f32 %v2063_v37, %v779_v56 }
 0x211   :  { %v1067_v59 = vpop.f32.mrf.mxu2 }
 0x212   :  { %818 = vmatmul.bf16.vlgmr.msrb.gmra.mxu3 %v614_v57  ;;  %v1300_v6 = vmax.f32 %v1298_v55, %v1299_v1  ;;  %v1068_v13 = vadd.f32 %v2160_v62, %v1067_v59  ;;  %v891_v18 = vmax.f32 %v780_v3, 0.0  ;;  %v578_v57 = vmax.f32 %v497_v44, 0.0  ;;  %v506_v3 = vpop.f32.mrf.mxu3 }
 0x213   :  { %v507_v39 = vadd.f32 %v2233_v43, %v506_v3 }
 0x214   :  { %v1301_v7 = vrot.slane %v1300_v6, 2  ;;  %v1206_v26 = vmax.f32 %v1068_v13, 0.0  ;;  %v616_v5 = vpack.c.bf16 %v579_v58, %v578_v57  ;;  %v502_v13 = vadd.f32 %v2233_v43, %v501_v8 }
 0x216   :  { %v1302_v20 = vmax.f32 %v1300_v6, %v1301_v7 }
 0x217   :  { %v781_v10 = vpop.f32.mrf.mxu1 }
 0x218   :  { %v782_v15 = vadd.f32 %v2063_v37, %v781_v10  ;;  %v1303_v19 = vrot.slane %v1302_v20, 1 }
 0x219   :  { %v1069_v17 = vpop.f32.mrf.mxu2 }
 0x21a   :  { %v892_v4 = vmax.f32 %v782_v15, 0.0  ;;  %v1070_v22 = vadd.f32 %v2160_v62, %v1069_v17  ;;  %v1304_v42 = vmax.f32 %v1302_v20, %v1303_v19 }
 0x21c   :  { %v939_v11 = vpack.c.bf16 %v892_v4, %v891_v18  ;;  %v1207_v28 = vmax.f32 %v1070_v22, 0.0  ;;  %v1523_v56 = vsel %vm1522_vm7, %v1304_v42, %v1521_v51  ;;  %v508_v22 = vpop.f32.mrf.mxu3  ;;  %v582_v51 = vmax.f32 %v507_v39, 0.0 }
 0x21d   :  { %v509_v21 = vadd.f32 %v2233_v43, %v508_v22 }
 0x21e   :  { %v1305_v30 = vmax.f32 %v1206_v26, %v1207_v28  ;;  %1111 = vmatmul.bf16.gmra.mxu2 %v939_v11  ;;  %v580_v26 = vmax.f32 %v502_v13, 0.0  ;;  %v581_v11 = vmax.f32 %v504_v0, 0.0 }
 0x21f   :  { %v784_v24 = vpop.f32.mrf.mxu1 }
 0x220   :  { %v1306_v12 = vrot.slane %v1305_v30, 4  ;;  %v785_v41 = vadd.f32 %v2063_v37, %v784_v24  ;;  %v617_v31 = vpack.c.bf16 %v581_v11, %v580_v26 }
 0x221   :  { %v1072_v16 = vpop.f32.mrf.mxu2 }
 0x222   :  { %v1307_v34 = vmax.f32 %v1305_v30, %v1306_v12  ;;  %823 = vmatmul.bf16.gmra.mxu3 %v615_v32  ;;  %v1073_v49 = vadd.f32 %v2160_v62, %v1072_v16  ;;  %v893_v54 = vmax.f32 %v785_v41, 0.0 }
 0x224   :  { %v1308_v38 = vrot.slane %v1307_v34, 2  ;;  %v1208_v59 = vmax.f32 %v1073_v49, 0.0  ;;  %v511_v16 = vpop.f32.mrf.mxu3 }
 0x226   :  { %v1309_v40 = vmax.f32 %v1307_v34, %v1308_v38 }
 0x227   :  { %v786_v46 = vpop.f32.mrf.mxu1 }
 0x228   :  { %v1310_v48 = vrot.slane %v1309_v40, 1  ;;  %v787_v50 = vadd.f32 %v2063_v37, %v786_v46 }
 0x229   :  { %v1074_v52 = vpop.f32.mrf.mxu2 }
 0x22a   :  { %v1311_v53 = vmax.f32 %v1309_v40, %v1310_v48  ;;  %v894_v55 = vmax.f32 %v787_v50, 0.0  ;;  %v1075_v35 = vadd.f32 %v2160_v62, %v1074_v52  ;;  %v583_v52 = vmax.f32 %v509_v21, 0.0 }
 0x22c   :  { %v1525_v61 = vsel %vm1524_vm8, %v1311_v53, %v1523_v56  ;;  %v940_v60 = vpack.c.bf16 %v894_v55, %v893_v54  ;;  %v1209_v63 = vmax.f32 %v1075_v35, 0.0  ;;  %v513_v56 = vpop.f32.mrf.mxu3 }
 0x22d   :  { %1551 = vst [vmem:[%s2386_s7] sm:$0xff] %v1525_v61 }
 0x22e   :  { %v1312_v1 = vmax.f32 %v1208_v59, %v1209_v63  ;;  %1116 = vmatmul.bf16.gmra.mxu2 %v940_v60 }
 0x22f   :  { %v789_v2 = vpop.f32.mrf.mxu1 }
 0x230   :  { %v1313_v9 = vrot.slane %v1312_v1, 4  ;;  %v790_v10 = vadd.f32 %v2063_v37, %v789_v2  ;;  %v2265_v2 = vld [vmem:[%s2383_s4] ss:$0 sm:$0xff] }
 0x231   :  { %v1077_v6 = vpop.f32.mrf.mxu2 }
 0x232   :  { %828 = vmatmul.bf16.gmra.mxu3 %v616_v5  ;;  %v1078_v15 = vadd.f32 %v2160_v62, %v1077_v6  ;;  %v1314_v18 = vmax.f32 %v1312_v1, %v1313_v9  ;;  %v895_v23 = vmax.f32 %v790_v10, 0.0  ;;  %v512_v5 = vadd.f32 %v2233_v43, %v511_v16 }
 0x233   :  { %v514_v6 = vadd.f32 %v2233_v43, %v513_v56 }
 0x234   :  { %v1210_v27 = vmax.f32 %v1078_v15, 0.0  ;;  %v1315_v8 = vrot.slane %v1314_v18, 2  ;;  %v516_v10 = vpop.f32.mrf.mxu3 }
 0x236   :  { %v1316_v12 = vmax.f32 %v1314_v18, %v1315_v8 }
 0x237   :  { %v791_v14 = vpop.f32.mrf.mxu1 }
 0x238   :  { %v792_v17 = vadd.f32 %v2063_v37, %v791_v14  ;;  %v1317_v19 = vrot.slane %v1316_v12, 1 }
 0x239   :  { %v1079_v4 = vpop.f32.mrf.mxu2 }
 0x23a   :  { %v896_v7 = vmax.f32 %v792_v17, 0.0  ;;  %v1080_v25 = vadd.f32 %v2160_v62, %v1079_v4  ;;  %v1318_v45 = vmax.f32 %v1316_v12, %v1317_v19  ;;  %v517_v19 = vadd.f32 %v2233_v43, %v516_v10 }
 0x23c   :  { %v941_v28 = vpack.c.bf16 %v896_v7, %v895_v23  ;;  %v1211_v29 = vmax.f32 %v1080_v25, 0.0  ;;  %v584_v23 = vmax.f32 %v512_v5, 0.0  ;;  %v585_v7 = vmax.f32 %v514_v6, 0.0 }
 0x23e   :  { %v1319_v30 = vmax.f32 %v1210_v27, %v1211_v29  ;;  %1121 = vmatmul.bf16.gmra.mxu2 %v941_v28 }
 0x23f   :  { %v794_v20 = vpop.f32.mrf.mxu1 }
 0x240   :  { %v1320_v24 = vrot.slane %v1319_v30, 4  ;;  %v795_v38 = vadd.f32 %v2063_v37, %v794_v20 }
 0x241   :  { %v1082_v32 = vpop.f32.mrf.mxu2 }
 0x242   :  { %v1321_v33 = vmax.f32 %v1319_v30, %v1320_v24  ;;  %833 = vmatmul.bf16.gmra.mxu3 %v617_v31  ;;  %v1083_v42 = vadd.f32 %v2160_v62, %v1082_v32  ;;  %v897_v48 = vmax.f32 %v795_v38, 0.0  ;;  %v619_v30 = vpack.c.bf16 %v585_v7, %v584_v23  ;;  %v518_v24 = vpop.f32.mrf.mxu3 }
 0x244   :  { %v1322_v34 = vrot.slane %v1321_v33, 2  ;;  %v1212_v54 = vmax.f32 %v1083_v42, 0.0 }
 0x246   :  { %v1323_v36 = vmax.f32 %v1321_v33, %v1322_v34 }
 0x247   :  { %v796_v40 = vpop.f32.mrf.mxu1 }
 0x248   :  { %v1324_v41 = vrot.slane %v1323_v36, 1  ;;  %v797_v44 = vadd.f32 %v2063_v37, %v796_v40  ;;  %v618_v37 = vpack.c.bf16 %v583_v52, %v582_v51 }
 0x249   :  { %v1084_v46 = vpop.f32.mrf.mxu2 }
 0x24a   :  { %v1325_v47 = vmax.f32 %v1323_v36, %v1324_v41  ;;  %v898_v49 = vmax.f32 %v797_v44, 0.0  ;;  %v1085_v50 = vadd.f32 %v2160_v62, %v1084_v46  ;;  %v519_v36 = vadd.f32 %v2233_v43, %v518_v24  ;;  %v521_v42 = vpop.f32.mrf.mxu3 }
 0x24c   :  { %v1526_v53 = vsel %vm1512_vm2, %v1325_v47, %v1318_v45  ;;  %v942_v55 = vpack.c.bf16 %v898_v49, %v897_v48  ;;  %v1213_v35 = vmax.f32 %v1085_v50, 0.0  ;;  %v586_v45 = vmax.f32 %v517_v19, 0.0 }
 0x24d   :  { %v587_v46 = vmax.f32 %v519_v36, 0.0 }
 0x24e   :  { %v1326_v57 = vmax.f32 %v1212_v54, %v1213_v35  ;;  %1126 = vmatmul.bf16.gmra.mxu2 %v942_v55  ;;  %v522_v54 = vadd.f32 %v2233_v43, %v521_v42 }
 0x24f   :  { %v799_v58 = vpop.f32.mrf.mxu1  ;;  %v620_v49 = vpack.c.bf16 %v587_v46, %v586_v45 }
 0x250   :  { %v1327_v61 = vrot.slane %v1326_v57, 4  ;;  %v800_v3 = vadd.f32 %v2265_v2, %v799_v58 }
 0x251   :  { %v1087_v59 = vpop.f32.mrf.mxu2 }
 0x252   :  { %v1328_v60 = vmax.f32 %v1326_v57, %v1327_v61  ;;  %838 = vmatmul.bf16.gmra.mxu3 %v618_v37  ;;  %v1088_v14 = vadd.f32 %v2160_v62, %v1087_v59  ;;  %v899_v18 = vmax.f32 %v800_v3, 0.0  ;;  %v523_v51 = vpop.f32.mrf.mxu3  ;;  %v588_v61 = vmax.f32 %v522_v54, 0.0 }
 0x253   :  { %v524_v55 = vadd.f32 %v2233_v43, %v523_v51 }
 0x254   :  { %v1329_v63 = vrot.slane %v1328_v60, 2  ;;  %v1214_v26 = vmax.f32 %v1088_v14, 0.0 }
 0x255   :  { %v589_v37 = vmax.f32 %v524_v55, 0.0 }
 0x256   :  { %v1330_v1 = vmax.f32 %v1328_v60, %v1329_v63 }
 0x257   :  { %v801_v9 = vpop.f32.mrf.mxu1  ;;  %v621_v63 = vpack.c.bf16 %v589_v37, %v588_v61 }
 0x258   :  { %v1331_v13 = vrot.slane %v1330_v1, 1  ;;  %v802_v15 = vadd.f32 %v2265_v2, %v801_v9 }
 0x259   :  { %v1089_v0 = vpop.f32.mrf.mxu2 }
 0x25a   :  { %v1332_v17 = vmax.f32 %v1330_v1, %v1331_v13  ;;  %v900_v4 = vmax.f32 %v802_v15, 0.0  ;;  %v1090_v22 = vadd.f32 %v2160_v62, %v1089_v0 }
 0x25c   :  { %v1527_v25 = vsel %vm1514_vm3, %v1332_v17, %v1526_v53  ;;  %v943_v27 = vpack.c.bf16 %v900_v4, %v899_v18  ;;  %v1215_v11 = vmax.f32 %v1090_v22, 0.0 }
 0x25e   :  { %v1333_v28 = vmax.f32 %v1214_v26, %v1215_v11  ;;  %1131 = vmatmul.bf16.gmra.mxu2 %v943_v27 }
 0x25f   :  { %v804_v29 = vpop.f32.mrf.mxu1 }
 0x260   :  { %v1334_v8 = vrot.slane %v1333_v28, 4  ;;  %v805_v33 = vadd.f32 %v2265_v2, %v804_v29 }
 0x261   :  { %v1092_v20 = vpop.f32.mrf.mxu2 }
 0x262   :  { %v1335_v31 = vmax.f32 %v1333_v28, %v1334_v8  ;;  %843 = vmatmul.bf16.gmra.mxu3 %v619_v30  ;;  %v901_v40 = vmax.f32 %v805_v33, 0.0  ;;  %v1093_v43 = vadd.f32 %v2160_v62, %v1092_v20 }
 0x264   :  { %v1336_v12 = vrot.slane %v1335_v31, 2  ;;  %v1216_v23 = vmax.f32 %v1093_v43, 0.0 }
 0x266   :  { %v1337_v32 = vmax.f32 %v1335_v31, %v1336_v12 }
 0x267   :  { %v806_v16 = vpop.f32.mrf.mxu1 }
 0x268   :  { %v1338_v34 = vrot.slane %v1337_v32, 1  ;;  %v807_v38 = vadd.f32 %v2265_v2, %v806_v16 }
 0x269   :  { %v1094_v39 = vpop.f32.mrf.mxu2 }
 0x26a   :  { %v1339_v21 = vmax.f32 %v1337_v32, %v1338_v34  ;;  %v902_v41 = vmax.f32 %v807_v38, 0.0  ;;  %v1095_v3 = vadd.f32 %v2160_v62, %v1094_v39 }
 0x26c   :  { %v2279_v44 = vsel %vm1516_vm4, %v1339_v21, %v1527_v25  ;;  %v944_v47 = vpack.c.bf16 %v902_v41, %v901_v40  ;;  %v1217_v14 = vmax.f32 %v1095_v3, 0.0 }
 0x26e   :  { %1136 = vmatmul.bf16.gmra.mxu2 %v944_v47  ;;  %v1340_v27 = vmax.f32 %v1216_v23, %v1217_v14 }
 0x26f   :  { %v809_v48 = vpop.f32.mrf.mxu1 }
 0x270   :  { %v810_v52 = vadd.f32 %v2265_v2, %v809_v48  ;;  %v1341_v8 = vrot.slane %v1340_v27, 4 }
 0x271   :  { %v1097_v50 = vpop.f32.mrf.mxu2 }
 0x272   :  { %848 = vmatmul.bf16.gmra.mxu3 %v620_v49  ;;  %v903_v57 = vmax.f32 %v810_v52, 0.0  ;;  %v1098_v10 = vadd.f32 %v2160_v62, %v1097_v50  ;;  %v1342_v31 = vmax.f32 %v1340_v27, %v1341_v8 }
 0x274   :  { %v1218_v7 = vmax.f32 %v1098_v10, 0.0  ;;  %v1343_v34 = vrot.slane %v1342_v31, 2 }
 0x276   :  { %v1344_v42 = vmax.f32 %v1342_v31, %v1343_v34 }
 0x277   :  { %v811_v53 = vpop.f32.mrf.mxu1 }
 0x278   :  { %v812_v35 = vadd.f32 %v2265_v2, %v811_v53  ;;  %v1345_v53 = vrot.slane %v1344_v42, 1 }
 0x279   :  { %v1099_v56 = vpop.f32.mrf.mxu2 }
 0x27a   :  { %v904_v58 = vmax.f32 %v812_v35, 0.0  ;;  %v1100_v5 = vadd.f32 %v2160_v62, %v1099_v56  ;;  %v1346_v61 = vmax.f32 %v1344_v42, %v1345_v53 }
 0x27c   :  { %v945_v59 = vpack.c.bf16 %v904_v58, %v903_v57  ;;  %v1219_v17 = vmax.f32 %v1100_v5, 0.0  ;;  %v1529_v5 = vsel %vm1518_vm5, %v1346_v61, %v2279_v44 }
 0x27e   :  { %1141 = vmatmul.bf16.gmra.mxu2 %v945_v59  ;;  %v1347_v28 = vmax.f32 %v1218_v7, %v1219_v17 }
 0x27f   :  { %v814_v60 = vpop.f32.mrf.mxu1 }
 0x280   :  { %v815_v6 = vadd.f32 %v2265_v2, %v814_v60  ;;  %v1348_v20 = vrot.slane %v1347_v28, 4 }
 0x281   :  { %v1102_v1 = vpop.f32.mrf.mxu2 }
 0x282   :  { %853 = vmatmul.bf16.gmra.mxu3 %v621_v63  ;;  %v1103_v15 = vadd.f32 %v2160_v62, %v1102_v1  ;;  %v905_v18 = vmax.f32 %v815_v6, 0.0  ;;  %v1349_v32 = vmax.f32 %v1347_v28, %v1348_v20 }
 0x284   :  { %v1220_v11 = vmax.f32 %v1103_v15, 0.0  ;;  %v1350_v36 = vrot.slane %v1349_v32, 2 }
 0x286   :  { %v1351_v46 = vmax.f32 %v1349_v32, %v1350_v36 }
 0x287   :  { %v816_v9 = vpop.f32.mrf.mxu1 }
 0x288   :  { %v817_v13 = vadd.f32 %v2265_v2, %v816_v9  ;;  %v1352_v55 = vrot.slane %v1351_v46, 1 }
 0x289   :  { %v1104_v0 = vpop.f32.mrf.mxu2 }
 0x28a   :  { %v906_v4 = vmax.f32 %v817_v13, 0.0  ;;  %v1105_v22 = vadd.f32 %v2160_v62, %v1104_v0  ;;  %v1353_v59 = vmax.f32 %v1351_v46, %v1352_v55  ;;  %v2316_v46 = vld [vmem:[%s2385_s6] ss:$0 sm:$0xff] }
 0x28c   :  { %v946_v25 = vpack.c.bf16 %v906_v4, %v905_v18  ;;  %v1221_v26 = vmax.f32 %v1105_v22, 0.0  ;;  %v1530_v43 = vsel %vm1520_vm6, %v1353_v59, %v1529_v5 }
 0x28e   :  { %1146 = vmatmul.bf16.gmra.mxu2 %v946_v25  ;;  %v1354_v29 = vmax.f32 %v1220_v11, %v1221_v26 }
 0x290   :  { %v1355_v24 = vrot.slane %v1354_v29, 4 }
 0x291   :  { %v1107_v30 = vpop.f32.mrf.mxu2 }
 0x292   :  { %v1356_v33 = vmax.f32 %v1354_v29, %v1355_v24  ;;  %v1108_v16 = vadd.f32 %v2160_v62, %v1107_v30 }
 0x294   :  { %v1357_v39 = vrot.slane %v1356_v33, 2  ;;  %v1222_v21 = vmax.f32 %v1108_v16, 0.0 }
 0x295   :  { %v819_v12 = vpop.f32.mrf.mxu3 }
 0x296   :  { %v820_v40 = vadd.f32 %v2265_v2, %v819_v12  ;;  %v1358_v49 = vmax.f32 %v1356_v33, %v1357_v39 }
 0x298   :  { %v907_v50 = vmax.f32 %v820_v40, 0.0  ;;  %v1359_v57 = vrot.slane %v1358_v49, 1 }
 0x299   :  { %v1109_v19 = vpop.f32.mrf.mxu2 }
 0x29a   :  { %v1110_v38 = vadd.f32 %v2160_v62, %v1109_v19  ;;  %v1360_v63 = vmax.f32 %v1358_v49, %v1359_v57 }
 0x29c   :  { %v1223_v41 = vmax.f32 %v1110_v38, 0.0  ;;  %v1531_v13 = vsel %vm1522_vm7, %v1360_v63, %v1530_v43 }
 0x29d   :  { %v821_v45 = vpop.f32.mrf.mxu3 }
 0x29e   :  { %v1361_v47 = vmax.f32 %v1222_v21, %v1223_v41  ;;  %v822_v48 = vadd.f32 %v2265_v2, %v821_v45 }
 0x2a0   :  { %v1362_v51 = vrot.slane %v1361_v47, 4  ;;  %v908_v52 = vmax.f32 %v822_v48, 0.0 }
 0x2a1   :  { %v1112_v54 = vpop.f32.mrf.mxu2 }
 0x2a2   :  { %v1363_v35 = vmax.f32 %v1361_v47, %v1362_v51  ;;  %v947_v56 = vpack.c.bf16 %v908_v52, %v907_v50  ;;  %v1113_v3 = vadd.f32 %v2160_v62, %v1112_v54 }
 0x2a4   :  { %v1364_v58 = vrot.slane %v1363_v35, 2  ;;  %1151 = vmatmul.bf16.vlgmr.msra.gmra.mxu3 %v947_v56  ;;  %v1224_v15 = vmax.f32 %v1113_v3, 0.0 }
 0x2a5   :  { %v824_v37 = vpop.f32.mrf.mxu3 }
 0x2a6   :  { %v1365_v60 = vmax.f32 %v1363_v35, %v1364_v58  ;;  %v825_v0 = vadd.f32 %v2265_v2, %v824_v37 }
 0x2a8   :  { %v1366_v1 = vrot.slane %v1365_v60, 1  ;;  %v909_v22 = vmax.f32 %v825_v0, 0.0 }
 0x2a9   :  { %v1114_v6 = vpop.f32.mrf.mxu2 }
 0x2aa   :  { %v1367_v9 = vmax.f32 %v1365_v60, %v1366_v1  ;;  %v1115_v10 = vadd.f32 %v2160_v62, %v1114_v6 }
 0x2ac   :  { %v1532_v14 = vsel %vm1524_vm8, %v1367_v9, %v1531_v13  ;;  %v1225_v17 = vmax.f32 %v1115_v10, 0.0 }
 0x2ad   :  { %1552 = vst [vmem:[%s2386_s7 + $0x8] sm:$0xff] %v1532_v14  ;;  %v826_v18 = vpop.f32.mrf.mxu3 }
 0x2ae   :  { %v1368_v44 = vmax.f32 %v1224_v15, %v1225_v17  ;;  %v827_v4 = vadd.f32 %v2265_v2, %v826_v18 }
 0x2b0   :  { %v910_v23 = vmax.f32 %v827_v4, 0.0  ;;  %v1369_v27 = vrot.slane %v1368_v44, 4 }
 0x2b1   :  { %v1117_v7 = vpop.f32.mrf.mxu2 }
 0x2b2   :  { %v948_v25 = vpack.c.bf16 %v910_v23, %v909_v22  ;;  %v1118_v11 = vadd.f32 %v2160_v62, %v1117_v7  ;;  %v1370_v29 = vmax.f32 %v1368_v44, %v1369_v27 }
 0x2b4   :  { %1156 = vmatmul.bf16.gmra.mxu3 %v948_v25  ;;  %v1226_v30 = vmax.f32 %v1118_v11, 0.0  ;;  %v1371_v12 = vrot.slane %v1370_v29, 2 }
 0x2b5   :  { %v829_v26 = vpop.f32.mrf.mxu3 }
 0x2b6   :  { %v830_v20 = vadd.f32 %v2265_v2, %v829_v26  ;;  %v1372_v38 = vmax.f32 %v1370_v29, %v1371_v12 }
 0x2b8   :  { %v911_v16 = vmax.f32 %v830_v20, 0.0 }
 0x2b9   :  { %v1119_v28 = vpop.f32.mrf.mxu2 }
 0x2ba   :  { %v1120_v8 = vadd.f32 %v2160_v62, %v1119_v28  ;;  %v1373_v62 = vrot.slane %v1372_v38, 1 }
 0x2bc   :  { %v1227_v24 = vmax.f32 %v1120_v8, 0.0  ;;  %v1374_v49 = vmax.f32 %v1372_v38, %v1373_v62 }
 0x2bd   :  { %v831_v31 = vpop.f32.mrf.mxu3 }
 0x2be   :  { %v1375_v32 = vmax.f32 %v1226_v30, %v1227_v24  ;;  %v832_v33 = vadd.f32 %v2265_v2, %v831_v31 }
 0x2c0   :  { %v1376_v34 = vrot.slane %v1375_v32, 4  ;;  %v912_v19 = vmax.f32 %v832_v33, 0.0 }
 0x2c1   :  { %v1122_v36 = vpop.f32.mrf.mxu2 }
 0x2c2   :  { %v1377_v39 = vmax.f32 %v1375_v32, %v1376_v34  ;;  %v949_v21 = vpack.c.bf16 %v912_v19, %v911_v16  ;;  %v1123_v47 = vadd.f32 %v2316_v46, %v1122_v36 }
 0x2c4   :  { %v1378_v40 = vrot.slane %v1377_v39, 2  ;;  %1161 = vmatmul.bf16.gmra.mxu3 %v949_v21  ;;  %v1228_v53 = vmax.f32 %v1123_v47, 0.0 }
 0x2c5   :  { %v834_v41 = vpop.f32.mrf.mxu3 }
 0x2c6   :  { %v1379_v42 = vmax.f32 %v1377_v39, %v1378_v40  ;;  %v835_v54 = vadd.f32 %v2265_v2, %v834_v41 }
 0x2c8   :  { %v1380_v45 = vrot.slane %v1379_v42, 1  ;;  %v913_v58 = vmax.f32 %v835_v54, 0.0 }
 0x2c9   :  { %v1124_v48 = vpop.f32.mrf.mxu2 }
 0x2ca   :  { %v1381_v50 = vmax.f32 %v1379_v42, %v1380_v45  ;;  %v1125_v51 = vadd.f32 %v2316_v46, %v1124_v48 }
 0x2cc   :  { %v1533_v52 = vsel %vm1512_vm2, %v1381_v50, %v1374_v49  ;;  %v1229_v55 = vmax.f32 %v1125_v51, 0.0 }
 0x2cd   :  { %v836_v35 = vpop.f32.mrf.mxu3 }
 0x2ce   :  { %v1382_v56 = vmax.f32 %v1228_v53, %v1229_v55  ;;  %v837_v57 = vadd.f32 %v2265_v2, %v836_v35 }
 0x2d0   :  { %v1383_v61 = vrot.slane %v1382_v56, 4  ;;  %v914_v37 = vmax.f32 %v837_v57, 0.0 }
 0x2d1   :  { %v1127_v59 = vpop.f32.mrf.mxu2 }
 0x2d2   :  { %v1384_v60 = vmax.f32 %v1382_v56, %v1383_v61  ;;  %v950_v63 = vpack.c.bf16 %v914_v37, %v913_v58  ;;  %v1128_v43 = vadd.f32 %v2316_v46, %v1127_v59 }
 0x2d4   :  { %v1385_v1 = vrot.slane %v1384_v60, 2  ;;  %1166 = vmatmul.bf16.gmra.mxu3 %v950_v63  ;;  %v1230_v15 = vmax.f32 %v1128_v43, 0.0 }
 0x2d5   :  { %v839_v3 = vpop.f32.mrf.mxu3 }
 0x2d6   :  { %v1386_v5 = vmax.f32 %v1384_v60, %v1385_v1  ;;  %v840_v0 = vadd.f32 %v2265_v2, %v839_v3 }
 0x2d8   :  { %v1387_v6 = vrot.slane %v1386_v5, 1  ;;  %v915_v22 = vmax.f32 %v840_v0, 0.0 }
 0x2d9   :  { %v1129_v9 = vpop.f32.mrf.mxu2 }
 0x2da   :  { %v1388_v10 = vmax.f32 %v1386_v5, %v1387_v6  ;;  %v1130_v13 = vadd.f32 %v2316_v46, %v1129_v9 }
 0x2dc   :  { %v1534_v14 = vsel %vm1514_vm3, %v1388_v10, %v1533_v52  ;;  %v1231_v17 = vmax.f32 %v1130_v13, 0.0 }
 0x2dd   :  { %v841_v18 = vpop.f32.mrf.mxu3 }
 0x2de   :  { %v1389_v44 = vmax.f32 %v1230_v15, %v1231_v17  ;;  %v842_v4 = vadd.f32 %v2265_v2, %v841_v18 }
 0x2e0   :  { %v1390_v23 = vrot.slane %v1389_v44, 4  ;;  %v916_v7 = vmax.f32 %v842_v4, 0.0 }
 0x2e1   :  { %v1132_v25 = vpop.f32.mrf.mxu2 }
 0x2e2   :  { %v1391_v26 = vmax.f32 %v1389_v44, %v1390_v23  ;;  %v951_v27 = vpack.c.bf16 %v916_v7, %v915_v22  ;;  %v1133_v50 = vadd.f32 %v2316_v46, %v1132_v25 }
 0x2e4   :  { %v1392_v11 = vrot.slane %v1391_v26, 2  ;;  %1171 = vmatmul.bf16.gmra.mxu3 %v951_v27  ;;  %v1232_v56 = vmax.f32 %v1133_v50, 0.0 }
 0x2e5   :  { %v844_v28 = vpop.f32.mrf.mxu3 }
 0x2e6   :  { %v1393_v29 = vmax.f32 %v1391_v26, %v1392_v11  ;;  %v845_v31 = vadd.f32 %v2265_v2, %v844_v28 }
 0x2e8   :  { %v1394_v8 = vrot.slane %v1393_v29, 1  ;;  %v917_v33 = vmax.f32 %v845_v31, 0.0 }
 0x2e9   :  { %v1134_v30 = vpop.f32.mrf.mxu2 }
 0x2ea   :  { %v1395_v20 = vmax.f32 %v1393_v29, %v1394_v8  ;;  %v1135_v47 = vadd.f32 %v2316_v46, %v1134_v30 }
 0x2ec   :  { %v2329_v24 = vsel %vm1516_vm4, %v1395_v20, %v1534_v14  ;;  %v1233_v52 = vmax.f32 %v1135_v47, 0.0 }
 0x2ed   :  { %v846_v12 = vpop.f32.mrf.mxu3 }
 0x2ee   :  { %v847_v32 = vadd.f32 %v2265_v2, %v846_v12  ;;  %v1396_v37 = vmax.f32 %v1232_v56, %v1233_v52 }
 0x2f0   :  { %v918_v16 = vmax.f32 %v847_v32, 0.0  ;;  %v1397_v43 = vrot.slane %v1396_v37, 4 }
 0x2f1   :  { %v1137_v34 = vpop.f32.mrf.mxu2 }
 0x2f2   :  { %v952_v19 = vpack.c.bf16 %v918_v16, %v917_v33  ;;  %v1138_v51 = vadd.f32 %v2316_v46, %v1137_v34  ;;  %v1398_v15 = vmax.f32 %v1396_v37, %v1397_v43 }
 0x2f4   :  { %1176 = vmatmul.bf16.gmra.mxu3 %v952_v19  ;;  %v1234_v57 = vmax.f32 %v1138_v51, 0.0  ;;  %v1399_v44 = vrot.slane %v1398_v15, 2 }
 0x2f5   :  { %v849_v36 = vpop.f32.mrf.mxu3 }
 0x2f6   :  { %v850_v39 = vadd.f32 %v2265_v2, %v849_v36  ;;  %v1400_v26 = vmax.f32 %v1398_v15, %v1399_v44 }
 0x2f8   :  { %v919_v41 = vmax.f32 %v850_v39, 0.0  ;;  %v1401_v8 = vrot.slane %v1400_v26, 1 }
 0x2f9   :  { %v1139_v38 = vpop.f32.mrf.mxu2 }
 0x2fa   :  { %v1140_v49 = vadd.f32 %v2316_v46, %v1139_v38  ;;  %v1402_v32 = vmax.f32 %v1400_v26, %v1401_v8 }
 0x2fc   :  { %v1235_v55 = vmax.f32 %v1140_v49, 0.0  ;;  %v1536_v38 = vsel %vm1518_vm5, %v1402_v32, %v2329_v24 }
 0x2fd   :  { %v851_v21 = vpop.f32.mrf.mxu3 }
 0x2fe   :  { %v852_v40 = vadd.f32 %v2265_v2, %v851_v21  ;;  %v1403_v63 = vmax.f32 %v1234_v57, %v1235_v55 }
 0x300   :  { %v920_v62 = vmax.f32 %v852_v40, 0.0  ;;  %v1404_v10 = vrot.slane %v1403_v63, 4 }
 0x301   :  { %v1142_v42 = vpop.f32.mrf.mxu2 }
 0x302   :  { %v953_v45 = vpack.c.bf16 %v920_v62, %v919_v41  ;;  %v1143_v53 = vadd.f32 %v2316_v46, %v1142_v42  ;;  %v1405_v0 = vmax.f32 %v1403_v63, %v1404_v10 }
 0x304   :  { %1181 = vmatmul.bf16.gmra.mxu3 %v953_v45  ;;  %v1236_v59 = vmax.f32 %v1143_v53, 0.0  ;;  %v1406_v22 = vrot.slane %v1405_v0, 2 }
 0x305   :  { %v854_v48 = vpop.f32.mrf.mxu3 }
 0x306   :  { %v855_v58 = vadd.f32 %v2265_v2, %v854_v48  ;;  %v1407_v27 = vmax.f32 %v1405_v0, %v1406_v22 }
 0x308   :  { %v921_v5 = vmax.f32 %v855_v58, 0.0  ;;  %v1408_v30 = vrot.slane %v1407_v27, 1 }
 0x309   :  { %v1144_v54 = vpop.f32.mrf.mxu2 }
 0x30a   :  { %v1145_v35 = vadd.f32 %v2316_v46, %v1144_v54  ;;  %v1409_v33 = vmax.f32 %v1407_v27, %v1408_v30 }
 0x30c   :  { %v1237_v61 = vmax.f32 %v1145_v35, 0.0  ;;  %v1537_v39 = vsel %vm1520_vm6, %v1409_v33, %v1536_v38 }
 0x30d   :  { %v856_v60 = vpop.f32.mrf.mxu3 }
 0x30e   :  { %v857_v1 = vadd.f32 %v2265_v2, %v856_v60  ;;  %v1410_v3 = vmax.f32 %v1236_v59, %v1237_v61 }
 0x310   :  { %v922_v6 = vmax.f32 %v857_v1, 0.0  ;;  %v1411_v14 = vrot.slane %v1410_v3, 4 }
 0x311   :  { %v1147_v9 = vpop.f32.mrf.mxu2 }
 0x312   :  { %v954_v13 = vpack.c.bf16 %v922_v6, %v921_v5  ;;  %v1412_v17 = vmax.f32 %v1410_v3, %v1411_v14  ;;  %v1148_v18 = vadd.f32 %v2316_v46, %v1147_v9 }
 0x314   :  { %1186 = vmatmul.bf16.gmra.mxu3 %v954_v13  ;;  %v1413_v2 = vrot.slane %v1412_v17, 2  ;;  %v1238_v7 = vmax.f32 %v1148_v18, 0.0 }
 0x316   :  { %v1414_v28 = vmax.f32 %v1412_v17, %v1413_v2 }
 0x318   :  { %v1415_v31 = vrot.slane %v1414_v28, 1 }
 0x319   :  { %v1149_v4 = vpop.f32.mrf.mxu2 }
 0x31a   :  { %v1150_v23 = vadd.f32 %v2316_v46, %v1149_v4  ;;  %v1416_v34 = vmax.f32 %v1414_v28, %v1415_v31 }
 0x31c   :  { %v1239_v25 = vmax.f32 %v1150_v23, 0.0  ;;  %v1538_v40 = vsel %vm1522_vm7, %v1416_v34, %v1537_v39 }
 0x31e   :  { %v1417_v11 = vmax.f32 %v1238_v7, %v1239_v25 }
 0x320   :  { %v1418_v29 = vrot.slane %v1417_v11, 4 }
 0x322   :  { %v1419_v20 = vmax.f32 %v1417_v11, %v1418_v29 }
 0x324   :  { %v1420_v12 = vrot.slane %v1419_v20, 2 }
 0x326   :  { %v1421_v16 = vmax.f32 %v1419_v20, %v1420_v12 }
 0x327   :  { %v1152_v19 = vpop.f32.mrf.mxu3 }
 0x328   :  { %v1422_v36 = vrot.slane %v1421_v16, 1  ;;  %v1153_v62 = vadd.f32 %v2316_v46, %v1152_v19 }
 0x32a   :  { %v1423_v21 = vmax.f32 %v1421_v16, %v1422_v36  ;;  %v1240_v47 = vmax.f32 %v1153_v62, 0.0 }
 0x32c   :  { %v1539_v41 = vsel %vm1524_vm8, %v1423_v21, %v1538_v40 }
 0x32d   :  { %1553 = vst [vmem:[%s2386_s7 + $0x10] sm:$0xff] %v1539_v41 }
 0x32f   :  { %v1154_v42 = vpop.f32.mrf.mxu3 }
 0x330   :  { %v1155_v45 = vadd.f32 %v2316_v46, %v1154_v42 }
 0x332   :  { %v1241_v48 = vmax.f32 %v1155_v45, 0.0 }
 0x334   :  { %v1424_v49 = vmax.f32 %v1240_v47, %v1241_v48 }
 0x336   :  { %v1425_v50 = vrot.slane %v1424_v49, 4 }
 0x337   :  { %v1157_v24 = vpop.f32.mrf.mxu3 }
 0x338   :  { %v1158_v51 = vadd.f32 %v2316_v46, %v1157_v24  ;;  %v1426_v53 = vmax.f32 %v1424_v49, %v1425_v50 }
 0x33a   :  { %v1242_v55 = vmax.f32 %v1158_v51, 0.0  ;;  %v1427_v56 = vrot.slane %v1426_v53, 2 }
 0x33c   :  { %v1428_v37 = vmax.f32 %v1426_v53, %v1427_v56 }
 0x33e   :  { %v1429_v63 = vrot.slane %v1428_v37, 1 }
 0x33f   :  { %v1159_v52 = vpop.f32.mrf.mxu3 }
 0x340   :  { %v1160_v54 = vadd.f32 %v2316_v46, %v1159_v52  ;;  %v1430_v43 = vmax.f32 %v1428_v37, %v1429_v63 }
 0x342   :  { %v1243_v35 = vmax.f32 %v1160_v54, 0.0 }
 0x344   :  { %v1431_v57 = vmax.f32 %v1242_v55, %v1243_v35 }
 0x346   :  { %v1432_v58 = vrot.slane %v1431_v57, 4 }
 0x347   :  { %v1162_v61 = vpop.f32.mrf.mxu3 }
 0x348   :  { %v1433_v59 = vmax.f32 %v1431_v57, %v1432_v58  ;;  %v1163_v5 = vadd.f32 %v2316_v46, %v1162_v61 }
 0x34a   :  { %v1434_v60 = vrot.slane %v1433_v59, 2  ;;  %v1244_v14 = vmax.f32 %v1163_v5, 0.0 }
 0x34c   :  { %v1435_v1 = vmax.f32 %v1433_v59, %v1434_v60 }
 0x34e   :  { %v1436_v3 = vrot.slane %v1435_v1, 1 }
 0x34f   :  { %v1164_v6 = vpop.f32.mrf.mxu3 }
 0x350   :  { %v1437_v9 = vmax.f32 %v1435_v1, %v1436_v3  ;;  %v1165_v10 = vadd.f32 %v2316_v46, %v1164_v6 }
 0x352   :  { %v1540_v13 = vsel %vm1512_vm2, %v1437_v9, %v1430_v43  ;;  %v1245_v15 = vmax.f32 %v1165_v10, 0.0 }
 0x354   :  { %v1438_v0 = vmax.f32 %v1244_v14, %v1245_v15 }
 0x356   :  { %v1439_v17 = vrot.slane %v1438_v0, 4 }
 0x357   :  { %v1167_v18 = vpop.f32.mrf.mxu3 }
 0x358   :  { %v1440_v44 = vmax.f32 %v1438_v0, %v1439_v17  ;;  %v1168_v2 = vadd.f32 %v2316_v46, %v1167_v18 }
 0x35a   :  { %v1441_v4 = vrot.slane %v1440_v44, 2  ;;  %v1246_v11 = vmax.f32 %v1168_v2, 0.0 }
 0x35c   :  { %v1442_v22 = vmax.f32 %v1440_v44, %v1441_v4 }
 0x35e   :  { %v1443_v23 = vrot.slane %v1442_v22, 1 }
 0x35f   :  { %v1169_v7 = vpop.f32.mrf.mxu3 }
 0x360   :  { %v1444_v25 = vmax.f32 %v1442_v22, %v1443_v23  ;;  %v1170_v26 = vadd.f32 %v2316_v46, %v1169_v7 }
 0x362   :  { %v1541_v27 = vsel %vm1514_vm3, %v1444_v25, %v1540_v13  ;;  %v1247_v28 = vmax.f32 %v1170_v26, 0.0 }
 0x364   :  { %v1445_v29 = vmax.f32 %v1246_v11, %v1247_v28 }
 0x366   :  { %v1446_v8 = vrot.slane %v1445_v29, 4 }
 0x367   :  { %v1172_v30 = vpop.f32.mrf.mxu3 }
 0x368   :  { %v1447_v20 = vmax.f32 %v1445_v29, %v1446_v8  ;;  %v1173_v40 = vadd.f32 %v2316_v46, %v1172_v30 }
 0x36a   :  { %v1448_v31 = vrot.slane %v1447_v20, 2  ;;  %v1248_v49 = vmax.f32 %v1173_v40, 0.0 }
 0x36c   :  { %v1449_v12 = vmax.f32 %v1447_v20, %v1448_v31 }
 0x36e   :  { %v1450_v32 = vrot.slane %v1449_v12, 1 }
 0x36f   :  { %v1174_v33 = vpop.f32.mrf.mxu3 }
 0x370   :  { %v1451_v16 = vmax.f32 %v1449_v12, %v1450_v32  ;;  %v1175_v39 = vadd.f32 %v2316_v46, %v1174_v33 }
 0x372   :  { %v1542_v34 = vsel %vm1516_vm4, %v1451_v16, %v1541_v27  ;;  %v1249_v62 = vmax.f32 %v1175_v39, 0.0 }
 0x374   :  { %v1452_v51 = vmax.f32 %v1248_v49, %v1249_v62 }
 0x376   :  { %v1453_v55 = vrot.slane %v1452_v51, 4 }
 0x377   :  { %v1177_v19 = vpop.f32.mrf.mxu3 }
 0x378   :  { %v1178_v41 = vadd.f32 %v2316_v46, %v1177_v19  ;;  %v1454_v58 = vmax.f32 %v1452_v51, %v1453_v55 }
 0x37a   :  { %v1250_v24 = vmax.f32 %v1178_v41, 0.0  ;;  %v1455_v60 = vrot.slane %v1454_v58, 2 }
 0x37c   :  { %v1456_v9 = vmax.f32 %v1454_v58, %v1455_v60 }
 0x37e   :  { %v1457_v0 = vrot.slane %v1456_v9, 1 }
 0x37f   :  { %v1179_v36 = vpop.f32.mrf.mxu3 }
 0x380   :  { %v1180_v21 = vadd.f32 %v2316_v46, %v1179_v36  ;;  %v1458_v22 = vmax.f32 %v1456_v9, %v1457_v0 }
 0x382   :  { %v1251_v47 = vmax.f32 %v1180_v21, 0.0 }
 0x384   :  { %v1459_v53 = vmax.f32 %v1250_v24, %v1251_v47 }
 0x386   :  { %v1460_v56 = vrot.slane %v1459_v53, 4 }
 0x387   :  { %v1182_v38 = vpop.f32.mrf.mxu3 }
 0x388   :  { %v1183_v42 = vadd.f32 %v2316_v46, %v1182_v38  ;;  %v1461_v61 = vmax.f32 %v1459_v53, %v1460_v56 }
 0x38a   :  { %v1252_v52 = vmax.f32 %v1183_v42, 0.0  ;;  %v1462_v1 = vrot.slane %v1461_v61, 2 }
 0x38c   :  { %v1463_v10 = vmax.f32 %v1461_v61, %v1462_v1 }
 0x38e   :  { %v1464_v17 = vrot.slane %v1463_v10, 1 }
 0x38f   :  { %v1184_v45 = vpop.f32.mrf.mxu3 }
 0x390   :  { %v1185_v48 = vadd.f32 %v2316_v46, %v1184_v45  ;;  %v1465_v23 = vmax.f32 %v1463_v10, %v1464_v17 }
 0x392   :  { %v1253_v50 = vmax.f32 %v1185_v48, 0.0 }
 0x394   :  { %v1466_v54 = vmax.f32 %v1252_v52, %v1253_v50 }
 0x396   :  { %v1467_v57 = vrot.slane %v1466_v54, 4 }
 0x397   :  { %v1187_v35 = vpop.f32.mrf.mxu3 }
 0x398   :  { %v1468_v37 = vmax.f32 %v1466_v54, %v1467_v57  ;;  %v1188_v59 = vadd.f32 %v2316_v46, %v1187_v35 }
 0x39a   :  { %v1469_v5 = vrot.slane %v1468_v37, 2  ;;  %v1254_v6 = vmax.f32 %v1188_v59, 0.0 }
 0x39c   :  { %v1470_v14 = vmax.f32 %v1468_v37, %v1469_v5 }
 0x39e   :  { %v1471_v44 = vrot.slane %v1470_v14, 1 }
 0x39f   :  { %v1189_v63 = vpop.f32.mrf.mxu3 }
 0x3a0   :  { %v1190_v3 = vadd.f32 %v2316_v46, %v1189_v63  ;;  %v1472_v7 = vmax.f32 %v1470_v14, %v1471_v44  ;;  %v1543_v46 = vsel %vm1518_vm5, %v1458_v22, %v1542_v34 }
 0x3a1   :  { %v1544_v26 = vsel %vm1520_vm6, %v1465_v23, %v1543_v46 }
 0x3a2   :  { %v1255_v43 = vmax.f32 %v1190_v3, 0.0  ;;  %v1545_v11 = vsel %vm1522_vm7, %v1472_v7, %v1544_v26 }
 0x3a4   :  { %v1473_v13 = vmax.f32 %v1254_v6, %v1255_v43 }
 0x3a6   :  { %v1474_v15 = vrot.slane %v1473_v13, 4 }
 0x3a8   :  { %v1475_v18 = vmax.f32 %v1473_v13, %v1474_v15 }
 0x3aa   :  { %v1476_v4 = vrot.slane %v1475_v18, 2 }
 0x3ac   :  { %v1477_v2 = vmax.f32 %v1475_v18, %v1476_v4 }
 0x3ae   :  { %v1478_v25 = vrot.slane %v1477_v2, 1 }
 0x3b0   :  { %v1479_v27 = vmax.f32 %v1477_v2, %v1478_v25 }
 0x3b2   :  { %v1546_v28 = vsel %vm1524_vm8, %v1479_v27, %v1545_v11 }
 0x3b3   :  { %1554 = vst [vmem:[%s2386_s7 + $0x18] sm:$0xff] %v1546_v28 }

// kernel: pointnet_sa_msg_forward.2
= control target key start
LH: loop header
LB: loop body
LE: loop exit
PB: predicated region body
PF: predicated region fallthrough
CT: control target
= control target key end

     0   :  { %vm187_vm0 = vcmask 1043456   ;;  %vm138_vm1 = vcmask 64512   ;;  %vm741_vm2 = vcmask 1041409   ;;  %vm743_vm3 = vcmask 1042434   ;;  %s1173_s1 = inlined_call_operand.vmem [shape: bf16[8,128], index: 1, kind: input, shape index: {}]   ;;  %s1174_s0 = inlined_call_operand.vmem [shape: bf16[256,8], index: 0, kind: input, shape index: {}]   ;;  %s1175_s2 = inlined_call_operand.vmem [shape: f32[1,128], index: 2, kind: input, shape index: {}]   ;;  %s1176_s3 = inlined_call_operand.vmem [shape: bf16[128,128], index: 3, kind: input, shape index: {}]   ;;  %s1177_s4 = inlined_call_operand.vmem [shape: f32[1,128], index: 4, kind: input, shape index: {}]   ;;  %s1178_s5 = inlined_call_operand.vmem [shape: f32[32,128], index: 5, kind: output, shape index: {}]  }
   0x1   :  { %v53_v0 = vld [vmem:[%s1173_s1] sm:$0xf]  ;;  %v901_v3 = vld [vmem:[%s1174_s0 + $0x8] sm:$0xff]  ;;  %v902_v4 = vld [vmem:[%s1174_s0 + $0x10] sm:$0xff]  ;;  %vm745_vm4 = vcmask 1043459   ;;  %vm747_vm5 = vcmask 1044484  }
   0x2   :  { %v189_v1 = vsel %vm187_vm0, %v53_v0, 0  ;;  %v900_v2 = vld [vmem:[%s1174_s0] sm:$0xff]  ;;  %v903_v5 = vld [vmem:[%s1174_s0 + $0x18] sm:$0xff]  ;;  %v905_v8 = vld [vmem:[%s1174_s0 + $0x28] sm:$0xff]  ;;  %vm749_vm6 = vcmask 1045509   ;;  %vm751_vm7 = vcmask 1046534  }
   0x3   :  { %198 = vmatpush.bf16.msra.mxu0 %v189_v1  ;;  %924 = vmatpush.bf16.msra.mxu3 %v189_v1  ;;  %v904_v6 = vld [vmem:[%s1174_s0 + $0x20] sm:$0xff]  ;;  %v923_v7 = vld [vmem:[%s1176_s3 + $0x38] sm:$0xff]  ;;  %v922_v9 = vld [vmem:[%s1176_s3 + $0x30] sm:$0xff]  ;;  %vm753_vm8 = vcmask 1047559  }
   0x4   :  { %396 = vmatpush.bf16.msra.mxu1 %v923_v7  ;;  %925 = vmatpush.bf16.msra.mxu2 %v923_v7  ;;  %v921_v10 = vld [vmem:[%s1176_s3 + $0x28] sm:$0xff]  ;;  %v920_v11 = vld [vmem:[%s1176_s3 + $0x20] sm:$0xff]  ;;  %v919_v12 = vld [vmem:[%s1176_s3 + $0x18] sm:$0xff] }
   0x5   :  { %v906_v13 = vld [vmem:[%s1174_s0 + $0x30] sm:$0xff]  ;;  %v909_v15 = vld [vmem:[%s1174_s0 + $0x48] sm:$0xff]  ;;  %v916_v17 = vld [vmem:[%s1176_s3] sm:$0xff] }
   0x6   :  { %852 = vmatmul.msk.bf16.vlgmr.msra.gmra.mxu0 %vm138_vm1, %v900_v2  ;;  %v918_v14 = vld [vmem:[%s1176_s3 + $0x10] sm:$0xff]  ;;  %861 = vmatmul.msk.bf16.vlgmr.msra.gmra.mxu3 %vm138_vm1, %v909_v15  ;;  %v917_v16 = vld [vmem:[%s1176_s3 + $0x8] sm:$0xff]  ;;  %v907_v18 = vld [vmem:[%s1174_s0 + $0x38] sm:$0xff] }
   0x7   :  { %v910_v19 = vld [vmem:[%s1174_s0 + $0x50] sm:$0xff]  ;;  %v908_v20 = vld [vmem:[%s1174_s0 + $0x40] sm:$0xff]  ;;  %v911_v23 = vld [vmem:[%s1174_s0 + $0x58] sm:$0xff] }
   0x8   :  { %397 = vmatpush.bf16.msra.mxu1 %v922_v9  ;;  %926 = vmatpush.bf16.msra.mxu2 %v922_v9  ;;  %v1038_v22 = vld [vmem:[%s1175_s2] ss:$0 sm:$0xff]  ;;  %v913_v39 = vld [vmem:[%s1174_s0 + $0x68] sm:$0xff]  ;;  %v914_v47 = vld [vmem:[%s1174_s0 + $0x70] sm:$0xff] }
   0x9   :  { %v912_v31 = vld [vmem:[%s1174_s0 + $0x60] sm:$0xff]  ;;  %v915_v55 = vld [vmem:[%s1174_s0 + $0x78] sm:$0xff] }
   0xc   :  { %398 = vmatpush.bf16.msra.mxu1 %v921_v10  ;;  %927 = vmatpush.bf16.msra.mxu2 %v921_v10 }
  0x10   :  { %399 = vmatpush.bf16.msra.mxu1 %v920_v11  ;;  %928 = vmatpush.bf16.msra.mxu2 %v920_v11 }
  0x14   :  { %400 = vmatpush.bf16.msra.mxu1 %v919_v12  ;;  %929 = vmatpush.bf16.msra.mxu2 %v919_v12 }
  0x16   :  { %853 = vmatmul.msk.bf16.gmra.mxu0 %vm138_vm1, %v901_v3  ;;  %862 = vmatmul.msk.bf16.gmra.mxu3 %vm138_vm1, %v910_v19 }
  0x18   :  { %401 = vmatpush.bf16.msra.mxu1 %v918_v14  ;;  %930 = vmatpush.bf16.msra.mxu2 %v918_v14 }
  0x1c   :  { %402 = vmatpush.bf16.msra.mxu1 %v917_v16  ;;  %931 = vmatpush.bf16.msra.mxu2 %v917_v16 }
  0x20   :  { %403 = vmatpush.bf16.msra.mxu1 %v916_v17  ;;  %932 = vmatpush.bf16.msra.mxu2 %v916_v17 }
  0x26   :  { %854 = vmatmul.msk.bf16.gmra.mxu0 %vm138_vm1, %v902_v4  ;;  %863 = vmatmul.msk.bf16.gmra.mxu3 %vm138_vm1, %v911_v23 }
  0x36   :  { %855 = vmatmul.msk.bf16.gmra.mxu0 %vm138_vm1, %v903_v5  ;;  %864 = vmatmul.msk.bf16.gmra.mxu3 %vm138_vm1, %v912_v31 }
  0x46   :  { %856 = vmatmul.msk.bf16.gmra.mxu0 %vm138_vm1, %v904_v6  ;;  %865 = vmatmul.msk.bf16.gmra.mxu3 %vm138_vm1, %v913_v39 }
  0x56   :  { %857 = vmatmul.msk.bf16.gmra.mxu0 %vm138_vm1, %v905_v8  ;;  %866 = vmatmul.msk.bf16.gmra.mxu3 %vm138_vm1, %v914_v47 }
  0x66   :  { %858 = vmatmul.msk.bf16.gmra.mxu0 %vm138_vm1, %v906_v13  ;;  %867 = vmatmul.msk.bf16.gmra.mxu3 %vm138_vm1, %v915_v55 }
  0x76   :  { %859 = vmatmul.msk.bf16.gmra.mxu0 %vm138_vm1, %v907_v18 }
  0x83   :  { %v200_v21 = vpop.f32.mrf.mxu0 }
  0x84   :  { %v201_v24 = vadd.f32 %v1038_v22, %v200_v21 }
  0x86   :  { %860 = vmatmul.msk.bf16.gmra.mxu0 %vm138_vm1, %v908_v20  ;;  %v280_v27 = vmax.f32 %v201_v24, 0.0 }
  0x89   :  { %v245_v13 = vpop.f32.mrf.mxu3 }
  0x8b   :  { %v202_v25 = vpop.f32.mrf.mxu0 }
  0x8c   :  { %v203_v26 = vadd.f32 %v1038_v22, %v202_v25 }
  0x8e   :  { %v281_v28 = vmax.f32 %v203_v26, 0.0 }
  0x90   :  { %v312_v29 = vpack.c.bf16 %v281_v28, %v280_v27 }
  0x91   :  { %v247_v17 = vpop.f32.mrf.mxu3 }
  0x92   :  { %404 = vmatmul.bf16.vlgmr.msra.gmra.mxu1 %v312_v29 }
  0x93   :  { %v205_v30 = vpop.f32.mrf.mxu0 }
  0x94   :  { %v206_v32 = vadd.f32 %v1038_v22, %v205_v30 }
  0x96   :  { %v282_v35 = vmax.f32 %v206_v32, 0.0 }
  0x99   :  { %v250_v23 = vpop.f32.mrf.mxu3 }
  0x9b   :  { %v207_v33 = vpop.f32.mrf.mxu0 }
  0x9c   :  { %v208_v34 = vadd.f32 %v1038_v22, %v207_v33  ;;  %v246_v33 = vadd.f32 %v1038_v22, %v245_v13 }
  0x9e   :  { %v283_v36 = vmax.f32 %v208_v34, 0.0  ;;  %v248_v34 = vadd.f32 %v1038_v22, %v247_v17 }
  0xa0   :  { %v313_v37 = vpack.c.bf16 %v283_v36, %v282_v35  ;;  %v298_v36 = vmax.f32 %v246_v33, 0.0 }
  0xa1   :  { %v252_v31 = vpop.f32.mrf.mxu3 }
  0xa2   :  { %409 = vmatmul.bf16.gmra.mxu1 %v313_v37  ;;  %v299_v37 = vmax.f32 %v248_v34, 0.0 }
  0xa3   :  { %v210_v38 = vpop.f32.mrf.mxu0 }
  0xa4   :  { %v211_v40 = vadd.f32 %v1038_v22, %v210_v38  ;;  %v321_v39 = vpack.c.bf16 %v299_v37, %v298_v36 }
  0xa6   :  { %v284_v43 = vmax.f32 %v211_v40, 0.0 }
  0xa9   :  { %v255_v35 = vpop.f32.mrf.mxu3 }
  0xab   :  { %v212_v41 = vpop.f32.mrf.mxu0 }
  0xac   :  { %v213_v42 = vadd.f32 %v1038_v22, %v212_v41 }
  0xae   :  { %v285_v44 = vmax.f32 %v213_v42, 0.0  ;;  %v251_v42 = vadd.f32 %v1038_v22, %v250_v23 }
  0xb0   :  { %v314_v45 = vpack.c.bf16 %v285_v44, %v284_v43  ;;  %v253_v43 = vadd.f32 %v1038_v22, %v252_v31  ;;  %v300_v44 = vmax.f32 %v251_v42, 0.0 }
  0xb1   :  { %v257_v40 = vpop.f32.mrf.mxu3 }
  0xb2   :  { %414 = vmatmul.bf16.gmra.mxu1 %v314_v45  ;;  %v301_v45 = vmax.f32 %v253_v43, 0.0 }
  0xb3   :  { %v215_v46 = vpop.f32.mrf.mxu0 }
  0xb4   :  { %v216_v48 = vadd.f32 %v1038_v22, %v215_v46  ;;  %v1086_v46 = vld [vmem:[%s1177_s4] ss:$0 sm:$0xff] }
  0xb6   :  { %v286_v51 = vmax.f32 %v216_v48, 0.0 }
  0xb9   :  { %v260_v48 = vpop.f32.mrf.mxu3 }
  0xba   :  { %v261_v33 = vadd.f32 %v1038_v22, %v260_v48 }
  0xbb   :  { %v217_v49 = vpop.f32.mrf.mxu0 }
  0xbc   :  { %v218_v50 = vadd.f32 %v1038_v22, %v217_v49  ;;  %v322_v49 = vpack.c.bf16 %v301_v45, %v300_v44 }
  0xbe   :  { %v287_v52 = vmax.f32 %v218_v50, 0.0 }
  0xc0   :  { %v315_v53 = vpack.c.bf16 %v287_v52, %v286_v51 }
  0xc2   :  { %419 = vmatmul.bf16.gmra.mxu1 %v315_v53 }
  0xc3   :  { %v220_v54 = vpop.f32.mrf.mxu0 }
  0xc4   :  { %v221_v56 = vadd.f32 %v1038_v22, %v220_v54 }
  0xc6   :  { %v288_v59 = vmax.f32 %v221_v56, 0.0 }
  0xcb   :  { %v222_v57 = vpop.f32.mrf.mxu0 }
  0xcc   :  { %v223_v58 = vadd.f32 %v1038_v22, %v222_v57 }
  0xce   :  { %v289_v60 = vmax.f32 %v223_v58, 0.0 }
  0xd0   :  { %v316_v61 = vpack.c.bf16 %v289_v60, %v288_v59  ;;  %v256_v60 = vadd.f32 %v1038_v22, %v255_v35 }
  0xd2   :  { %424 = vmatmul.bf16.gmra.mxu1 %v316_v61  ;;  %v258_v61 = vadd.f32 %v1038_v22, %v257_v40 }
  0xd3   :  { %v225_v62 = vpop.f32.mrf.mxu0 }
  0xd4   :  { %v226_v63 = vadd.f32 %v1038_v22, %v225_v62 }
  0xd6   :  { %v290_v2 = vmax.f32 %v226_v63, 0.0 }
  0xdb   :  { %v227_v0 = vpop.f32.mrf.mxu0 }
  0xdc   :  { %v228_v1 = vadd.f32 %v1038_v22, %v227_v0  ;;  %v262_v0 = vpop.f32.mrf.mxu3 }
  0xdd   :  { %v263_v37 = vadd.f32 %v1038_v22, %v262_v0 }
  0xde   :  { %v291_v3 = vmax.f32 %v228_v1, 0.0 }
  0xe0   :  { %v317_v4 = vpack.c.bf16 %v291_v3, %v290_v2 }
  0xe2   :  { %429 = vmatmul.bf16.gmra.mxu1 %v317_v4 }
  0xe3   :  { %v230_v5 = vpop.f32.mrf.mxu0 }
  0xe4   :  { %v231_v6 = vadd.f32 %v1038_v22, %v230_v5 }
  0xe6   :  { %v292_v9 = vmax.f32 %v231_v6, 0.0  ;;  %v302_v6 = vmax.f32 %v256_v60, 0.0 }
  0xeb   :  { %v232_v7 = vpop.f32.mrf.mxu0 }
  0xec   :  { %v233_v8 = vadd.f32 %v1038_v22, %v232_v7  ;;  %v303_v7 = vmax.f32 %v258_v61, 0.0 }
  0xee   :  { %v293_v10 = vmax.f32 %v233_v8, 0.0 }
  0xf0   :  { %v318_v11 = vpack.c.bf16 %v293_v10, %v292_v9 }
  0xf2   :  { %434 = vmatmul.bf16.gmra.mxu1 %v318_v11 }
  0xf3   :  { %v235_v12 = vpop.f32.mrf.mxu0 }
  0xf4   :  { %v236_v14 = vadd.f32 %v1038_v22, %v235_v12 }
  0xf6   :  { %v294_v18 = vmax.f32 %v236_v14, 0.0 }
  0xfb   :  { %v237_v15 = vpop.f32.mrf.mxu0 }
  0xfc   :  { %v238_v16 = vadd.f32 %v1038_v22, %v237_v15 }
  0xfe   :  { %v295_v19 = vmax.f32 %v238_v16, 0.0  ;;  %v323_v16 = vpack.c.bf16 %v303_v7, %v302_v6 }
 0x100   :  { %v319_v20 = vpack.c.bf16 %v295_v19, %v294_v18 }
 0x102   :  { %439 = vmatmul.bf16.gmra.mxu1 %v319_v20 }
 0x103   :  { %v240_v21 = vpop.f32.mrf.mxu0 }
 0x104   :  { %v241_v24 = vadd.f32 %v1038_v22, %v240_v21 }
 0x106   :  { %v296_v27 = vmax.f32 %v241_v24, 0.0  ;;  %v1097_v24 = vpop.f32.mrf.mxu3 }
 0x10b   :  { %v242_v25 = vpop.f32.mrf.mxu0 }
 0x10c   :  { %v243_v26 = vadd.f32 %v1038_v22, %v242_v25 }
 0x10e   :  { %v297_v28 = vmax.f32 %v243_v26, 0.0  ;;  %v267_v48 = vpop.f32.mrf.mxu3 }
 0x10f   :  { %v405_v29 = vpop.f32.mrf.mxu1 }
 0x110   :  { %v320_v30 = vpack.c.bf16 %v297_v28, %v296_v27  ;;  %v406_v51 = vadd.f32 %v1086_v46, %v405_v29 }
 0x112   :  { %444 = vmatmul.bf16.vlgmr.msra.gmra.mxu2 %v320_v30  ;;  %v485_v56 = vmax.f32 %v406_v51, 0.0 }
 0x114   :  { %v517_v3 = vrot.slane %v485_v56, 4 }
 0x116   :  { %v518_v11 = vmax.f32 %v485_v56, %v517_v3 }
 0x117   :  { %v407_v32 = vpop.f32.mrf.mxu1 }
 0x118   :  { %v408_v50 = vadd.f32 %v1086_v46, %v407_v32  ;;  %v519_v21 = vrot.slane %v518_v11, 2 }
 0x11a   :  { %v486_v55 = vmax.f32 %v408_v50, 0.0  ;;  %v520_v31 = vmax.f32 %v518_v11, %v519_v21  ;;  %v305_v50 = vmax.f32 %v263_v37, 0.0 }
 0x11c   :  { %v523_v1 = vrot.slane %v486_v55, 4  ;;  %v521_v43 = vrot.slane %v520_v31, 1 }
 0x11e   :  { %v524_v9 = vmax.f32 %v486_v55, %v523_v1 }
 0x11f   :  { %v410_v38 = vpop.f32.mrf.mxu1 }
 0x120   :  { %v411_v52 = vadd.f32 %v1086_v46, %v410_v38  ;;  %v525_v18 = vrot.slane %v524_v9, 2 }
 0x122   :  { %449 = vmatmul.bf16.gmra.mxu2 %v321_v39  ;;  %v487_v57 = vmax.f32 %v411_v52, 0.0  ;;  %v526_v28 = vmax.f32 %v524_v9, %v525_v18 }
 0x124   :  { %v529_v4 = vrot.slane %v487_v57, 4  ;;  %v527_v40 = vrot.slane %v526_v28, 1 }
 0x126   :  { %v530_v12 = vmax.f32 %v487_v57, %v529_v4 }
 0x127   :  { %v412_v41 = vpop.f32.mrf.mxu1 }
 0x128   :  { %v413_v53 = vadd.f32 %v1086_v46, %v412_v41  ;;  %v531_v23 = vrot.slane %v530_v12, 2 }
 0x12a   :  { %v488_v59 = vmax.f32 %v413_v53, 0.0  ;;  %v532_v32 = vmax.f32 %v530_v12, %v531_v23  ;;  %v528_v53 = vmax.f32 %v526_v28, %v527_v40  ;;  %v270_v12 = vpop.f32.mrf.mxu3 }
 0x12b   :  { %v271_v23 = vadd.f32 %v1038_v22, %v270_v12 }
 0x12c   :  { %v535_v5 = vrot.slane %v488_v59, 4  ;;  %v533_v44 = vrot.slane %v532_v32, 1 }
 0x12e   :  { %v536_v14 = vmax.f32 %v488_v59, %v535_v5  ;;  %v534_v56 = vmax.f32 %v532_v32, %v533_v44  ;;  %v522_v59 = vmax.f32 %v520_v31, %v521_v43 }
 0x12f   :  { %v415_v47 = vpop.f32.mrf.mxu1 }
 0x130   :  { %v416_v54 = vadd.f32 %v1086_v46, %v415_v47  ;;  %v537_v25 = vrot.slane %v536_v14, 2  ;;  %v742_v0 = vsel %vm741_vm2, %v528_v53, %v522_v59 }
 0x131   :  { %v744_v3 = vsel %vm743_vm3, %v534_v56, %v742_v0 }
 0x132   :  { %454 = vmatmul.bf16.gmra.mxu2 %v322_v49  ;;  %v489_v63 = vmax.f32 %v416_v54, 0.0  ;;  %v538_v35 = vmax.f32 %v536_v14, %v537_v25  ;;  %v304_v49 = vmax.f32 %v261_v33, 0.0  ;;  %v266_v14 = vadd.f32 %v1038_v22, %v1097_v24 }
 0x134   :  { %v541_v8 = vrot.slane %v489_v63, 4  ;;  %v539_v47 = vrot.slane %v538_v35, 1 }
 0x136   :  { %v542_v17 = vmax.f32 %v489_v63, %v541_v8  ;;  %v540_v60 = vmax.f32 %v538_v35, %v539_v47 }
 0x137   :  { %v417_v58 = vpop.f32.mrf.mxu1 }
 0x138   :  { %v418_v62 = vadd.f32 %v1086_v46, %v417_v58  ;;  %v543_v27 = vrot.slane %v542_v17, 2  ;;  %v746_v5 = vsel %vm745_vm4, %v540_v60, %v744_v3 }
 0x13a   :  { %v490_v2 = vmax.f32 %v418_v62, 0.0  ;;  %v544_v39 = vmax.f32 %v542_v17, %v543_v27  ;;  %v324_v62 = vpack.c.bf16 %v305_v50, %v304_v49  ;;  %v308_v27 = vmax.f32 %v271_v23, 0.0 }
 0x13c   :  { %v547_v10 = vrot.slane %v490_v2, 4  ;;  %v545_v52 = vrot.slane %v544_v39, 1 }
 0x13e   :  { %v548_v19 = vmax.f32 %v490_v2, %v547_v10  ;;  %v546_v63 = vmax.f32 %v544_v39, %v545_v52 }
 0x13f   :  { %v420_v13 = vpop.f32.mrf.mxu1 }
 0x140   :  { %v421_v15 = vadd.f32 %v1086_v46, %v420_v13  ;;  %v549_v29 = vrot.slane %v548_v19, 2  ;;  %v748_v7 = vsel %vm747_vm5, %v546_v63, %v746_v5 }
 0x142   :  { %v491_v20 = vmax.f32 %v421_v15, 0.0  ;;  %459 = vmatmul.bf16.gmra.mxu2 %v323_v16  ;;  %v550_v41 = vmax.f32 %v548_v19, %v549_v29  ;;  %v268_v15 = vadd.f32 %v1038_v22, %v267_v48  ;;  %v306_v16 = vmax.f32 %v266_v14, 0.0 }
 0x144   :  { %v553_v26 = vrot.slane %v491_v20, 4  ;;  %v551_v54 = vrot.slane %v550_v41, 1  ;;  %v307_v17 = vmax.f32 %v268_v15, 0.0 }
 0x146   :  { %v554_v30 = vmax.f32 %v491_v20, %v553_v26  ;;  %v552_v1 = vmax.f32 %v550_v41, %v551_v54  ;;  %v325_v19 = vpack.c.bf16 %v307_v17, %v306_v16  ;;  %v272_v20 = vpop.f32.mrf.mxu3 }
 0x147   :  { %v422_v34 = vpop.f32.mrf.mxu1  ;;  %v273_v25 = vadd.f32 %v1038_v22, %v272_v20 }
 0x148   :  { %v555_v36 = vrot.slane %v554_v30, 2  ;;  %v423_v38 = vadd.f32 %v1086_v46, %v422_v34  ;;  %v750_v8 = vsel %vm749_vm6, %v552_v1, %v748_v7 }
 0x149   :  { %v309_v24 = vmax.f32 %v273_v25, 0.0 }
 0x14a   :  { %v492_v42 = vmax.f32 %v423_v38, 0.0  ;;  %v556_v45 = vmax.f32 %v554_v30, %v555_v36 }
 0x14b   :  { %v326_v29 = vpack.c.bf16 %v309_v24, %v308_v27 }
 0x14c   :  { %v559_v51 = vrot.slane %v492_v42, 4  ;;  %v557_v57 = vrot.slane %v556_v45, 1 }
 0x14e   :  { %v560_v55 = vmax.f32 %v492_v42, %v559_v51  ;;  %v558_v4 = vmax.f32 %v556_v45, %v557_v57  ;;  %v275_v26 = vpop.f32.mrf.mxu3 }
 0x14f   :  { %v425_v58 = vpop.f32.mrf.mxu1  ;;  %v276_v41 = vadd.f32 %v1038_v22, %v275_v26 }
 0x150   :  { %v561_v61 = vrot.slane %v560_v55, 2  ;;  %v752_v10 = vsel %vm751_vm7, %v558_v4, %v750_v8  ;;  %v426_v31 = vadd.f32 %v1086_v46, %v425_v58 }
 0x151   :  { %v310_v52 = vmax.f32 %v276_v41, 0.0 }
 0x152   :  { %v562_v2 = vmax.f32 %v560_v55, %v561_v61  ;;  %464 = vmatmul.bf16.gmra.mxu2 %v324_v62  ;;  %v493_v37 = vmax.f32 %v426_v31, 0.0 }
 0x154   :  { %v563_v6 = vrot.slane %v562_v2, 1  ;;  %v565_v50 = vrot.slane %v493_v37, 4 }
 0x156   :  { %v564_v9 = vmax.f32 %v562_v2, %v563_v6  ;;  %v277_v35 = vpop.f32.mrf.mxu3  ;;  %v566_v58 = vmax.f32 %v493_v37, %v565_v50 }
 0x157   :  { %v427_v11 = vpop.f32.mrf.mxu1  ;;  %v278_v42 = vadd.f32 %v1038_v22, %v277_v35 }
 0x158   :  { %v754_v13 = vsel %vm753_vm8, %v564_v9, %v752_v10  ;;  %v428_v30 = vadd.f32 %v1086_v46, %v427_v11  ;;  %v567_v2 = vrot.slane %v566_v58, 2 }
 0x159   :  { %780 = vst [vmem:[%s1178_s5] sm:$0xff] %v754_v13  ;;  %v311_v48 = vmax.f32 %v278_v42, 0.0 }
 0x15a   :  { %v494_v36 = vmax.f32 %v428_v30, 0.0  ;;  %v568_v11 = vmax.f32 %v566_v58, %v567_v2 }
 0x15b   :  { %v327_v22 = vpack.c.bf16 %v311_v48, %v310_v52 }
 0x15c   :  { %v571_v45 = vrot.slane %v494_v36, 4 }
 0x15e   :  { %v572_v54 = vmax.f32 %v494_v36, %v571_v45 }
 0x15f   :  { %v430_v18 = vpop.f32.mrf.mxu1 }
 0x160   :  { %v431_v32 = vadd.f32 %v1086_v46, %v430_v18  ;;  %v573_v62 = vrot.slane %v572_v54, 2 }
 0x162   :  { %469 = vmatmul.bf16.gmra.mxu2 %v325_v19  ;;  %v495_v38 = vmax.f32 %v431_v32, 0.0  ;;  %v574_v6 = vmax.f32 %v572_v54, %v573_v62 }
 0x164   :  { %v577_v49 = vrot.slane %v495_v38, 4  ;;  %v575_v16 = vrot.slane %v574_v6, 1 }
 0x166   :  { %v578_v56 = vmax.f32 %v495_v38, %v577_v49  ;;  %v576_v27 = vmax.f32 %v574_v6, %v575_v16 }
 0x167   :  { %v432_v21 = vpop.f32.mrf.mxu1 }
 0x168   :  { %v433_v33 = vadd.f32 %v1086_v46, %v432_v21  ;;  %v579_v1 = vrot.slane %v578_v56, 2  ;;  %v569_v21 = vrot.slane %v568_v11, 1 }
 0x16a   :  { %v496_v40 = vmax.f32 %v433_v33, 0.0  ;;  %v580_v9 = vmax.f32 %v578_v56, %v579_v1  ;;  %v570_v31 = vmax.f32 %v568_v11, %v569_v21 }
 0x16c   :  { %v583_v51 = vrot.slane %v496_v40, 4  ;;  %v581_v19 = vrot.slane %v580_v9, 1  ;;  %v755_v35 = vsel %vm741_vm2, %v576_v27, %v570_v31 }
 0x16e   :  { %v584_v59 = vmax.f32 %v496_v40, %v583_v51 }
 0x16f   :  { %v435_v28 = vpop.f32.mrf.mxu1 }
 0x170   :  { %v436_v34 = vadd.f32 %v1086_v46, %v435_v28  ;;  %v585_v3 = vrot.slane %v584_v59, 2 }
 0x172   :  { %474 = vmatmul.bf16.gmra.mxu2 %v326_v29  ;;  %v497_v44 = vmax.f32 %v436_v34, 0.0  ;;  %v586_v12 = vmax.f32 %v584_v59, %v585_v3  ;;  %v582_v29 = vmax.f32 %v580_v9, %v581_v19 }
 0x174   :  { %v589_v53 = vrot.slane %v497_v44, 4  ;;  %v587_v23 = vrot.slane %v586_v12, 1  ;;  %v756_v38 = vsel %vm743_vm3, %v582_v29, %v755_v35 }
 0x176   :  { %v590_v61 = vmax.f32 %v497_v44, %v589_v53  ;;  %v588_v32 = vmax.f32 %v586_v12, %v587_v23 }
 0x177   :  { %v437_v39 = vpop.f32.mrf.mxu1 }
 0x178   :  { %v438_v43 = vadd.f32 %v1086_v46, %v437_v39  ;;  %v591_v5 = vrot.slane %v590_v61, 2  ;;  %v757_v40 = vsel %vm745_vm4, %v588_v32, %v756_v38 }
 0x17a   :  { %v498_v47 = vmax.f32 %v438_v43, 0.0  ;;  %v592_v15 = vmax.f32 %v590_v61, %v591_v5 }
 0x17c   :  { %v595_v55 = vrot.slane %v498_v47, 4  ;;  %v593_v26 = vrot.slane %v592_v15, 1 }
 0x17e   :  { %v596_v63 = vmax.f32 %v498_v47, %v595_v55  ;;  %v594_v34 = vmax.f32 %v592_v15, %v593_v26 }
 0x17f   :  { %v440_v57 = vpop.f32.mrf.mxu1 }
 0x180   :  { %v441_v60 = vadd.f32 %v1086_v46, %v440_v57  ;;  %v597_v7 = vrot.slane %v596_v63, 2  ;;  %v758_v42 = vsel %vm747_vm5, %v594_v34, %v757_v40 }
 0x182   :  { %v499_v0 = vmax.f32 %v441_v60, 0.0  ;;  %479 = vmatmul.bf16.gmra.mxu2 %v327_v22  ;;  %v598_v17 = vmax.f32 %v596_v63, %v597_v7 }
 0x184   :  { %v601_v4 = vrot.slane %v499_v0, 4  ;;  %v599_v24 = vrot.slane %v598_v17, 1 }
 0x186   :  { %v602_v8 = vmax.f32 %v499_v0, %v601_v4  ;;  %v600_v36 = vmax.f32 %v598_v17, %v599_v24 }
 0x187   :  { %v442_v10 = vpop.f32.mrf.mxu1 }
 0x188   :  { %v603_v13 = vrot.slane %v602_v8, 2  ;;  %v443_v14 = vadd.f32 %v1086_v46, %v442_v10  ;;  %v759_v44 = vsel %vm749_vm6, %v600_v36, %v758_v42 }
 0x18a   :  { %v500_v18 = vmax.f32 %v443_v14, 0.0  ;;  %v604_v20 = vmax.f32 %v602_v8, %v603_v13 }
 0x18c   :  { %v607_v25 = vrot.slane %v500_v18, 4  ;;  %v605_v30 = vrot.slane %v604_v20, 1 }
 0x18e   :  { %v608_v28 = vmax.f32 %v500_v18, %v607_v25  ;;  %v606_v39 = vmax.f32 %v604_v20, %v605_v30 }
 0x190   :  { %v609_v33 = vrot.slane %v608_v28, 2  ;;  %v760_v47 = vsel %vm751_vm7, %v606_v39, %v759_v44 }
 0x192   :  { %v610_v37 = vmax.f32 %v608_v28, %v609_v33 }
 0x194   :  { %v611_v41 = vrot.slane %v610_v37, 1 }
 0x195   :  { %v445_v43 = vpop.f32.mrf.mxu2 }
 0x196   :  { %v612_v45 = vmax.f32 %v610_v37, %v611_v41  ;;  %v446_v55 = vadd.f32 %v1086_v46, %v445_v43 }
 0x198   :  { %v761_v49 = vsel %vm753_vm8, %v612_v45, %v760_v47  ;;  %v501_v22 = vmax.f32 %v446_v55, 0.0 }
 0x199   :  { %781 = vst [vmem:[%s1178_s5 + $0x8] sm:$0xff] %v761_v49 }
 0x19a   :  { %v613_v3 = vrot.slane %v501_v22, 4 }
 0x19c   :  { %v614_v10 = vmax.f32 %v501_v22, %v613_v3 }
 0x19d   :  { %v447_v50 = vpop.f32.mrf.mxu2 }
 0x19e   :  { %v448_v53 = vadd.f32 %v1086_v46, %v447_v50  ;;  %v615_v18 = vrot.slane %v614_v10, 2 }
 0x1a0   :  { %v502_v58 = vmax.f32 %v448_v53, 0.0  ;;  %v616_v28 = vmax.f32 %v614_v10, %v615_v18 }
 0x1a2   :  { %v619_v0 = vrot.slane %v502_v58, 4  ;;  %v617_v38 = vrot.slane %v616_v28, 1 }
 0x1a4   :  { %v620_v6 = vmax.f32 %v502_v58, %v619_v0  ;;  %v618_v50 = vmax.f32 %v616_v28, %v617_v38 }
 0x1a5   :  { %v450_v51 = vpop.f32.mrf.mxu2 }
 0x1a6   :  { %v451_v54 = vadd.f32 %v1086_v46, %v450_v51  ;;  %v621_v14 = vrot.slane %v620_v6, 2 }
 0x1a8   :  { %v503_v59 = vmax.f32 %v451_v54, 0.0  ;;  %v622_v23 = vmax.f32 %v620_v6, %v621_v14 }
 0x1aa   :  { %v625_v2 = vrot.slane %v503_v59, 4  ;;  %v623_v33 = vrot.slane %v622_v23, 1 }
 0x1ac   :  { %v626_v8 = vmax.f32 %v503_v59, %v625_v2  ;;  %v624_v42 = vmax.f32 %v622_v23, %v623_v33 }
 0x1ad   :  { %v452_v52 = vpop.f32.mrf.mxu2 }
 0x1ae   :  { %v453_v56 = vadd.f32 %v1086_v46, %v452_v52  ;;  %v627_v17 = vrot.slane %v626_v8, 2  ;;  %v762_v53 = vsel %vm741_vm2, %v624_v42, %v618_v50 }
 0x1b0   :  { %v504_v61 = vmax.f32 %v453_v56, 0.0  ;;  %v628_v27 = vmax.f32 %v626_v8, %v627_v17 }
 0x1b2   :  { %v631_v4 = vrot.slane %v504_v61, 4  ;;  %v629_v36 = vrot.slane %v628_v27, 1 }
 0x1b4   :  { %v632_v11 = vmax.f32 %v504_v61, %v631_v4  ;;  %v630_v45 = vmax.f32 %v628_v27, %v629_v36 }
 0x1b5   :  { %v455_v48 = vpop.f32.mrf.mxu2 }
 0x1b6   :  { %v456_v57 = vadd.f32 %v1086_v46, %v455_v48  ;;  %v633_v19 = vrot.slane %v632_v11, 2  ;;  %v763_v56 = vsel %vm743_vm3, %v630_v45, %v762_v53 }
 0x1b8   :  { %v505_v63 = vmax.f32 %v456_v57, 0.0  ;;  %v634_v29 = vmax.f32 %v632_v11, %v633_v19 }
 0x1ba   :  { %v637_v5 = vrot.slane %v505_v63, 4  ;;  %v635_v39 = vrot.slane %v634_v29, 1 }
 0x1bc   :  { %v638_v13 = vmax.f32 %v505_v63, %v637_v5  ;;  %v636_v51 = vmax.f32 %v634_v29, %v635_v39 }
 0x1bd   :  { %v457_v60 = vpop.f32.mrf.mxu2 }
 0x1be   :  { %v458_v62 = vadd.f32 %v1086_v46, %v457_v60  ;;  %v639_v21 = vrot.slane %v638_v13, 2  ;;  %v764_v58 = vsel %vm745_vm4, %v636_v51, %v763_v56 }
 0x1c0   :  { %v506_v1 = vmax.f32 %v458_v62, 0.0  ;;  %v640_v32 = vmax.f32 %v638_v13, %v639_v21 }
 0x1c2   :  { %v643_v7 = vrot.slane %v506_v1, 4  ;;  %v641_v41 = vrot.slane %v640_v32, 1 }
 0x1c4   :  { %v644_v15 = vmax.f32 %v506_v1, %v643_v7  ;;  %v642_v48 = vmax.f32 %v640_v32, %v641_v41 }
 0x1c5   :  { %v460_v9 = vpop.f32.mrf.mxu2 }
 0x1c6   :  { %v461_v12 = vadd.f32 %v1086_v46, %v460_v9  ;;  %v645_v25 = vrot.slane %v644_v15, 2  ;;  %v765_v60 = vsel %vm747_vm5, %v642_v48, %v764_v58 }
 0x1c8   :  { %v507_v16 = vmax.f32 %v461_v12, 0.0  ;;  %v646_v34 = vmax.f32 %v644_v15, %v645_v25 }
 0x1ca   :  { %v649_v20 = vrot.slane %v507_v16, 4  ;;  %v647_v43 = vrot.slane %v646_v34, 1 }
 0x1cc   :  { %v650_v26 = vmax.f32 %v507_v16, %v649_v20  ;;  %v648_v54 = vmax.f32 %v646_v34, %v647_v43 }
 0x1cd   :  { %v462_v24 = vpop.f32.mrf.mxu2 }
 0x1ce   :  { %v651_v30 = vrot.slane %v650_v26, 2  ;;  %v463_v31 = vadd.f32 %v1086_v46, %v462_v24  ;;  %v766_v22 = vsel %vm749_vm6, %v648_v54, %v765_v60 }
 0x1d0   :  { %v508_v35 = vmax.f32 %v463_v31, 0.0  ;;  %v652_v37 = vmax.f32 %v650_v26, %v651_v30 }
 0x1d2   :  { %v655_v40 = vrot.slane %v508_v35, 4  ;;  %v653_v47 = vrot.slane %v652_v37, 1 }
 0x1d4   :  { %v656_v44 = vmax.f32 %v508_v35, %v655_v40  ;;  %v654_v57 = vmax.f32 %v652_v37, %v653_v47 }
 0x1d5   :  { %v465_v49 = vpop.f32.mrf.mxu2 }
 0x1d6   :  { %v657_v52 = vrot.slane %v656_v44, 2  ;;  %v767_v62 = vsel %vm751_vm7, %v654_v57, %v766_v22  ;;  %v466_v6 = vadd.f32 %v1086_v46, %v465_v49 }
 0x1d8   :  { %v658_v55 = vmax.f32 %v656_v44, %v657_v52  ;;  %v509_v12 = vmax.f32 %v466_v6, 0.0 }
 0x1da   :  { %v659_v59 = vrot.slane %v658_v55, 1  ;;  %v661_v19 = vrot.slane %v509_v12, 4 }
 0x1dc   :  { %v660_v61 = vmax.f32 %v658_v55, %v659_v59  ;;  %v662_v24 = vmax.f32 %v509_v12, %v661_v19 }
 0x1dd   :  { %v467_v63 = vpop.f32.mrf.mxu2 }
 0x1de   :  { %v768_v0 = vsel %vm753_vm8, %v660_v61, %v767_v62  ;;  %v468_v4 = vadd.f32 %v1086_v46, %v467_v63  ;;  %v663_v35 = vrot.slane %v662_v24, 2 }
 0x1df   :  { %782 = vst [vmem:[%s1178_s5 + $0x10] sm:$0xff] %v768_v0 }
 0x1e0   :  { %v510_v9 = vmax.f32 %v468_v4, 0.0  ;;  %v664_v44 = vmax.f32 %v662_v24, %v663_v35 }
 0x1e2   :  { %v667_v16 = vrot.slane %v510_v9, 4  ;;  %v665_v55 = vrot.slane %v664_v44, 1 }
 0x1e4   :  { %v668_v23 = vmax.f32 %v510_v9, %v667_v16  ;;  %v666_v63 = vmax.f32 %v664_v44, %v665_v55 }
 0x1e5   :  { %v470_v1 = vpop.f32.mrf.mxu2 }
 0x1e6   :  { %v471_v5 = vadd.f32 %v1086_v46, %v470_v1  ;;  %v669_v31 = vrot.slane %v668_v23, 2 }
 0x1e8   :  { %v511_v10 = vmax.f32 %v471_v5, 0.0  ;;  %v670_v39 = vmax.f32 %v668_v23, %v669_v31 }
 0x1ea   :  { %v673_v18 = vrot.slane %v511_v10, 4  ;;  %v671_v51 = vrot.slane %v670_v39, 1 }
 0x1ec   :  { %v674_v26 = vmax.f32 %v511_v10, %v673_v18  ;;  %v672_v59 = vmax.f32 %v670_v39, %v671_v51 }
 0x1ed   :  { %v472_v2 = vpop.f32.mrf.mxu2 }
 0x1ee   :  { %v473_v7 = vadd.f32 %v1086_v46, %v472_v2  ;;  %v675_v34 = vrot.slane %v674_v26, 2 }
 0x1f0   :  { %v512_v13 = vmax.f32 %v473_v7, 0.0  ;;  %v676_v42 = vmax.f32 %v674_v26, %v675_v34 }
 0x1f2   :  { %v679_v20 = vrot.slane %v512_v13, 4  ;;  %v677_v53 = vrot.slane %v676_v42, 1 }
 0x1f4   :  { %v680_v28 = vmax.f32 %v512_v13, %v679_v20  ;;  %v678_v61 = vmax.f32 %v676_v42, %v677_v53 }
 0x1f5   :  { %v475_v3 = vpop.f32.mrf.mxu2 }
 0x1f6   :  { %v476_v8 = vadd.f32 %v1086_v46, %v475_v3  ;;  %v681_v36 = vrot.slane %v680_v28, 2 }
 0x1f8   :  { %v513_v15 = vmax.f32 %v476_v8, 0.0  ;;  %v682_v45 = vmax.f32 %v680_v28, %v681_v36 }
 0x1fa   :  { %v685_v21 = vrot.slane %v513_v15, 4  ;;  %v683_v56 = vrot.slane %v682_v45, 1 }
 0x1fc   :  { %v686_v30 = vmax.f32 %v513_v15, %v685_v21  ;;  %v684_v0 = vmax.f32 %v682_v45, %v683_v56 }
 0x1fd   :  { %v477_v11 = vpop.f32.mrf.mxu2 }
 0x1fe   :  { %v478_v14 = vadd.f32 %v1086_v46, %v477_v11  ;;  %v687_v38 = vrot.slane %v686_v30, 2 }
 0x200   :  { %v514_v17 = vmax.f32 %v478_v14, 0.0  ;;  %v688_v50 = vmax.f32 %v686_v30, %v687_v38 }
 0x202   :  { %v691_v25 = vrot.slane %v514_v17, 4  ;;  %v689_v58 = vrot.slane %v688_v50, 1 }
 0x204   :  { %v692_v32 = vmax.f32 %v514_v17, %v691_v25  ;;  %v690_v2 = vmax.f32 %v688_v50, %v689_v58 }
 0x205   :  { %v480_v27 = vpop.f32.mrf.mxu2 }
 0x206   :  { %v481_v29 = vadd.f32 %v1086_v46, %v480_v27  ;;  %v693_v40 = vrot.slane %v692_v32, 2 }
 0x208   :  { %v515_v33 = vmax.f32 %v481_v29, 0.0  ;;  %v694_v52 = vmax.f32 %v692_v32, %v693_v40 }
 0x20a   :  { %v697_v37 = vrot.slane %v515_v33, 4  ;;  %v695_v60 = vrot.slane %v694_v52, 1 }
 0x20c   :  { %v698_v41 = vmax.f32 %v515_v33, %v697_v37  ;;  %v696_v3 = vmax.f32 %v694_v52, %v695_v60 }
 0x20d   :  { %v482_v43 = vpop.f32.mrf.mxu2 }
 0x20e   :  { %v699_v47 = vrot.slane %v698_v41, 2  ;;  %v483_v49 = vadd.f32 %v1086_v46, %v482_v43  ;;  %v769_v46 = vsel %vm741_vm2, %v672_v59, %v666_v63 }
 0x20f   :  { %v770_v5 = vsel %vm743_vm3, %v678_v61, %v769_v46 }
 0x210   :  { %v516_v48 = vmax.f32 %v483_v49, 0.0  ;;  %v700_v54 = vmax.f32 %v698_v41, %v699_v47  ;;  %v771_v7 = vsel %vm745_vm4, %v684_v0, %v770_v5 }
 0x211   :  { %v772_v9 = vsel %vm747_vm5, %v690_v2, %v771_v7 }
 0x212   :  { %v703_v57 = vrot.slane %v516_v48, 4  ;;  %v701_v62 = vrot.slane %v700_v54, 1  ;;  %v773_v10 = vsel %vm749_vm6, %v696_v3, %v772_v9 }
 0x214   :  { %v704_v22 = vmax.f32 %v516_v48, %v703_v57  ;;  %v702_v6 = vmax.f32 %v700_v54, %v701_v62 }
 0x216   :  { %v705_v1 = vrot.slane %v704_v22, 2  ;;  %v774_v12 = vsel %vm751_vm7, %v702_v6, %v773_v10 }
 0x218   :  { %v706_v4 = vmax.f32 %v704_v22, %v705_v1 }
 0x21a   :  { %v707_v8 = vrot.slane %v706_v4, 1 }
 0x21c   :  { %v708_v11 = vmax.f32 %v706_v4, %v707_v8 }
 0x21e   :  { %v775_v13 = vsel %vm753_vm8, %v708_v11, %v774_v12 }
 0x21f   :  { %783 = vst [vmem:[%s1178_s5 + $0x18] sm:$0xff] %v775_v13 }

</bundles_post_ra>
